<compile_context>
chip_gen: v5e
topology: v5e:2x2
jax: 0.10.0
libtpu: 0.0.40
codegen_flags: <defaults>
</compile_context>

<pallas_src>
import functools

import jax
import jax.numpy as jnp
from jax.experimental import pallas as pl
from jax.experimental.pallas import tpu as pltpu

EPS = 1e-5
NEG_SLOPE = 0.1
LANE = 128                       # TPU lane width: channel-pad target
VMEM_LIMIT = 32 * 1024 * 1024    # scoped-VMEM budget, safe on v5e/v6e/v7x


def _round_up(x, m):
    return (x + m - 1) // m * m


def _pick_tile_h(h):
    for t in (8, 4, 2, 1):
        if h % t == 0:
            return t
    return 1


def _leaky(y):
    return jnp.where(y >= 0, y, NEG_SLOPE * y)


# ----------------------------------------------------------------------------
# Pass 1: conv3x3 (shift-and-matmul) + fused BN batch statistics
# ----------------------------------------------------------------------------
def _conv1_stats_kernel(x_ref, w_ref, c1_ref, st_ref, *,
                        H, W, tile_h, cin_p, cmid_p):
    # x_ref : (H+2, W+2, cin_p)   zero-padded image (batch dim squeezed)
    # w_ref : (3, 3, cin_p, cmid_p)
    # c1_ref: (tile_h, W, cmid_p) lane-dense output tile
    # st_ref: (2, cmid_p)         per-tile [sum, sum_of_squares]
    t = pl.program_id(1)
    r0 = pl.multiple_of(t * tile_h, tile_h)

    acc = jnp.zeros((tile_h * W, cmid_p), jnp.float32)
    for dy in range(3):
        rows = x_ref[pl.ds(r0 + dy, tile_h), :, :]            # (tile_h, W+2, cin_p)
        for dx in range(3):
            patch = rows[:, dx:dx + W, :].reshape(tile_h * W, cin_p)
            acc = acc + jnp.dot(patch, w_ref[dy, dx],
                                preferred_element_type=jnp.float32)

    c1_ref[...] = acc.reshape(tile_h, W, cmid_p)
    st_ref[...] = jnp.concatenate(
        [jnp.sum(acc, axis=0, keepdims=True),
         jnp.sum(acc * acc, axis=0, keepdims=True)], axis=0)


# ----------------------------------------------------------------------------
# Pass 2: BN1+LeakyReLU (in VMEM) -> conv3x3 ; 1x1 shortcut ; fused statistics
# ----------------------------------------------------------------------------
def _bn1_conv2_shortcut_kernel(c1_ref, sb1_ref, x_ref, w2_ref, ws_ref,
                               c2_ref, cs_ref, st_ref, hpad_ref, *,
                               H, W, tile_h, cin_p, cmid_p, cout_p):
    # c1_ref : (H, W, cmid_p)      full conv1 output (resident across tiles)
    # sb1_ref: (2, cmid_p)         folded BN1 [scale, bias]
    # x_ref  : (H+2, W+2, cin_p)   zero-padded input image
    # w2_ref : (3, 3, cmid_p, cout_p) ; ws_ref: (cin_p, cout_p)
    # c2_ref / cs_ref : (tile_h, W, cout_p) ; st_ref: (4, cout_p)
    # hpad_ref: VMEM scratch (H+2, W+2, cmid_p) holding zero-padded h
    t = pl.program_id(1)
    r0 = pl.multiple_of(t * tile_h, tile_h)

    # Build h = LeakyReLU(BN1(c1)) once per image; persists across the
    # sequential spatial-tile axis.  h never touches HBM.
    @pl.when(t == 0)
    def _():
        hpad_ref[...] = jnp.zeros_like(hpad_ref)
        h = c1_ref[...].reshape(H * W, cmid_p) * sb1_ref[0, :] + sb1_ref[1, :]
        hpad_ref[1:H + 1, 1:W + 1, :] = _leaky(h).reshape(H, W, cmid_p)

    # backbone conv2: 3x3 on h_pad
    acc2 = jnp.zeros((tile_h * W, cout_p), jnp.float32)
    for dy in range(3):
        rows = hpad_ref[pl.ds(r0 + dy, tile_h), :, :]
        for dx in range(3):
            patch = rows[:, dx:dx + W, :].reshape(tile_h * W, cmid_p)
            acc2 = acc2 + jnp.dot(patch, w2_ref[dy, dx],
                                  preferred_element_type=jnp.float32)

    # shortcut conv: 1x1 on x (centre of the padded image)
    rows_x = x_ref[pl.ds(r0 + 1, tile_h), :, :]
    xc = rows_x[:, 1:W + 1, :].reshape(tile_h * W, cin_p)
    accs = jnp.dot(xc, ws_ref[...], preferred_element_type=jnp.float32)

    c2_ref[...] = acc2.reshape(tile_h, W, cout_p)
    cs_ref[...] = accs.reshape(tile_h, W, cout_p)
    st_ref[...] = jnp.concatenate(
        [jnp.sum(acc2, axis=0, keepdims=True),
         jnp.sum(acc2 * acc2, axis=0, keepdims=True),
         jnp.sum(accs, axis=0, keepdims=True),
         jnp.sum(accs * accs, axis=0, keepdims=True)], axis=0)


# ----------------------------------------------------------------------------
# Pass 3: fused BN2-apply + BNs-apply + add + LeakyReLU (lane-dense blocks)
# ----------------------------------------------------------------------------
def _bn_add_leaky_kernel(c2_ref, cs_ref, sb_ref, y_ref):
    y = (c2_ref[...] * sb_ref[0, :] + sb_ref[1, :]
         + cs_ref[...] * sb_ref[2, :] + sb_ref[3, :])
    y_ref[...] = _leaky(y)


# ----------------------------------------------------------------------------
# BN statistics folding (tiny (C,) glue; stats come from the conv kernels)
# ----------------------------------------------------------------------------
def _fold_stats(sum_c, sumsq_c, count, gamma, beta):
    mean = sum_c / count
    var = jnp.maximum(sumsq_c / count - mean * mean, 0.0)   # biased variance
    scale = gamma * jax.lax.rsqrt(var + EPS)
    bias = beta - mean * scale
    return scale, bias


# ----------------------------------------------------------------------------
# ResBlock forward (NCHW in / NCHW out, like PyTorch)
# ----------------------------------------------------------------------------
def resblock_forward(x_nchw, params):
    # TODO(synk): only stride=1 (the module default) is implemented.
    N, Cin, H, W = x_nchw.shape
    Cout = params["w1"].shape[-1]

    cin_p = _round_up(Cin, LANE)
    cmid_p = _round_up(Cout, LANE)
    cout_p = _round_up(Cout, LANE)
    tile_h = _pick_tile_h(H)
    T = H // tile_h
    Hp, Wp = H + 2, W + 2
    f32 = jnp.float32

    # one-time layout plumbing: NCHW->NHWC, channel pad to lane width, 1px halo
    x = jnp.transpose(x_nchw, (0, 2, 3, 1)).astype(f32)
    x_pad = jnp.pad(x, ((0, 0), (1, 1), (1, 1), (0, cin_p - Cin)))

    def pad_w(w, ci_p, co_p):
        _, _, ci, co = w.shape
        return jnp.pad(w.astype(f32),
                       ((0, 0), (0, 0), (0, ci_p - ci), (0, co_p - co)))

    def pad_c(v, cp):
        return jnp.pad(v.astype(f32), (0, cp - v.shape[0]))

    w1 = pad_w(params["w1"], cin_p, cmid_p)
    w2 = pad_w(params["w2"], cmid_p, cout_p)
    ws = pad_w(params["ws"], cin_p, cout_p)[0, 0]            # (cin_p, cout_p)
    g1, b1 = pad_c(params["g1"], cmid_p), pad_c(params["b1"], cmid_p)
    g2, b2 = pad_c(params["g2"], cout_p), pad_c(params["b2"], cout_p)
    gs, bs = pad_c(params["gs"], cout_p), pad_c(params["bs"], cout_p)

    cparams = pltpu.CompilerParams(
        dimension_semantics=("parallel", "arbitrary"),
        vmem_limit_bytes=VMEM_LIMIT)

    # ---- pass 1: conv1 + fused batch statistics -----------------------------
    kernel_a = functools.partial(_conv1_stats_kernel, H=H, W=W, tile_h=tile_h,
                                 cin_p=cin_p, cmid_p=cmid_p)
    c1, st1 = pl.pallas_call(
        kernel_a,
        out_shape=(jax.ShapeDtypeStruct((N, H, W, cmid_p), f32),
                   jax.ShapeDtypeStruct((N, T, 2, cmid_p), f32)),
        grid=(N, T),
        in_specs=[
            pl.BlockSpec((None, Hp, Wp, cin_p), lambda n, t: (n, 0, 0, 0)),
            pl.BlockSpec((3, 3, cin_p, cmid_p), lambda n, t: (0, 0, 0, 0)),
        ],
        out_specs=(
            pl.BlockSpec((None, tile_h, W, cmid_p), lambda n, t: (n, t, 0, 0)),
            pl.BlockSpec((None, None, 2, cmid_p), lambda n, t: (n, t, 0, 0)),
        ),
        compiler_params=cparams,
    )(x_pad, w1)

    count = float(N * H * W)
    s1, bb1 = _fold_stats(jnp.sum(st1[:, :, 0, :], axis=(0, 1)),
                          jnp.sum(st1[:, :, 1, :], axis=(0, 1)), count, g1, b1)
    sb1 = jnp.stack([s1, bb1])                               # (2, cmid_p)

    # ---- pass 2: BN1+LReLU -> conv2 ; 1x1 shortcut ; fused statistics -------
    kernel_b = functools.partial(_bn1_conv2_shortcut_kernel, H=H, W=W,
                                 tile_h=tile_h, cin_p=cin_p, cmid_p=cmid_p,
                                 cout_p=cout_p)
    c2, cs, st2 = pl.pallas_call(
        kernel_b,
        out_shape=(jax.ShapeDtypeStruct((N, H, W, cout_p), f32),
                   jax.ShapeDtypeStruct((N, H, W, cout_p), f32),
                   jax.ShapeDtypeStruct((N, T, 4, cout_p), f32)),
        grid=(N, T),
        in_specs=[
            pl.BlockSpec((None, H, W, cmid_p), lambda n, t: (n, 0, 0, 0)),
            pl.BlockSpec((2, cmid_p), lambda n, t: (0, 0)),
            pl.BlockSpec((None, Hp, Wp, cin_p), lambda n, t: (n, 0, 0, 0)),
            pl.BlockSpec((3, 3, cmid_p, cout_p), lambda n, t: (0, 0, 0, 0)),
            pl.BlockSpec((cin_p, cout_p), lambda n, t: (0, 0)),
        ],
        out_specs=(
            pl.BlockSpec((None, tile_h, W, cout_p), lambda n, t: (n, t, 0, 0)),
            pl.BlockSpec((None, tile_h, W, cout_p), lambda n, t: (n, t, 0, 0)),
            pl.BlockSpec((None, None, 4, cout_p), lambda n, t: (n, t, 0, 0)),
        ),
        scratch_shapes=[pltpu.VMEM((Hp, Wp, cmid_p), f32)],
        compiler_params=cparams,
    )(c1, sb1, x_pad, w2, ws)

    s2, bb2 = _fold_stats(jnp.sum(st2[:, :, 0, :], axis=(0, 1)),
                          jnp.sum(st2[:, :, 1, :], axis=(0, 1)), count, g2, b2)
    ss, bbs = _fold_stats(jnp.sum(st2[:, :, 2, :], axis=(0, 1)),
                          jnp.sum(st2[:, :, 3, :], axis=(0, 1)), count, gs, bs)
    sb2 = jnp.stack([s2, bb2, ss, bbs])                      # (4, cout_p)

    # ---- pass 3: BN2 + BNs apply + add + LeakyReLU --------------------------
    y_p = pl.pallas_call(
        _bn_add_leaky_kernel,
        out_shape=jax.ShapeDtypeStruct((N, H, W, cout_p), f32),
        grid=(N, T),
        in_specs=[
            pl.BlockSpec((None, tile_h, W, cout_p), lambda n, t: (n, t, 0, 0)),
            pl.BlockSpec((None, tile_h, W, cout_p), lambda n, t: (n, t, 0, 0)),
            pl.BlockSpec((4, cout_p), lambda n, t: (0, 0)),
        ],
        out_specs=pl.BlockSpec((None, tile_h, W, cout_p),
                               lambda n, t: (n, t, 0, 0)),
        compiler_params=pltpu.CompilerParams(
            dimension_semantics=("parallel", "parallel"),
            vmem_limit_bytes=VMEM_LIMIT),
    )(c2, cs, sb2)

    # drop channel padding, NHWC -> NCHW (PyTorch layout)
    return jnp.transpose(y_p[..., :Cout], (0, 3, 1, 2)).astype(x_nchw.dtype)


# ----------------------------------------------------------------------------
# Pure-JAX reference (for correctness check)
# ----------------------------------------------------------------------------
def _ref_conv(x, w):
    kh, kw = w.shape[0], w.shape[1]
    pad = [((kh - 1) // 2,) * 2, ((kw - 1) // 2,) * 2]
    return jax.lax.conv_general_dilated(
        x, w, (1, 1), pad, dimension_numbers=("NHWC", "HWIO", "NHWC"))


def _ref_bn(x, g, b):
    m = jnp.mean(x, axis=(0, 1, 2))
    v = jnp.var(x, axis=(0, 1, 2))
    return (x - m) / jnp.sqrt(v + EPS) * g + b


def ref_resblock(x_nchw, params):
    x = jnp.transpose(x_nchw, (0, 2, 3, 1))
    h = _ref_bn(_ref_conv(x, params["w1"]), params["g1"], params["b1"])
    h = jnp.where(h >= 0, h, NEG_SLOPE * h)
    main = _ref_bn(_ref_conv(h, params["w2"]), params["g2"], params["b2"])
    sc = _ref_bn(_ref_conv(x, params["ws"]), params["gs"], params["bs"])
    y = main + sc
    y = jnp.where(y >= 0, y, NEG_SLOPE * y)
    return jnp.transpose(y, (0, 3, 1, 2))


# ----------------------------------------------------------------------------
if __name__ == "__main__":
    key = jax.random.PRNGKey(0)
    N, in_feat, out_feat, H, W = 2, 4, 8, 16, 16

    ks = jax.random.split(key, 8)
    params = {
        # conv weights in HWIO layout
        "w1": 0.1 * jax.random.normal(ks[0], (3, 3, in_feat, out_feat), jnp.float32),
        "w2": 0.1 * jax.random.normal(ks[1], (3, 3, out_feat, out_feat), jnp.float32),
        "ws": 0.1 * jax.random.normal(ks[2], (1, 1, in_feat, out_feat), jnp.float32),
        # BatchNorm affine params
        "g1": 1.0 + 0.1 * jax.random.normal(ks[3], (out_feat,), jnp.float32),
        "b1": 0.1 * jax.random.normal(ks[4], (out_feat,), jnp.float32),
        "g2": 1.0 + 0.1 * jax.random.normal(ks[5], (out_feat,), jnp.float32),
        "b2": 0.1 * jax.random.normal(ks[6], (out_feat,), jnp.float32),
        "gs": jnp.ones((out_feat,), jnp.float32),
        "bs": jnp.zeros((out_feat,), jnp.float32),
    }

    x = jax.random.normal(ks[7], (N, in_feat, H, W), jnp.float32)  # NCHW

    out = jax.block_until_ready(resblock_forward(x, params))
    ref = jax.block_until_ready(ref_resblock(x, params))

    assert out.shape == (N, out_feat, H, W)
    err = jnp.max(jnp.abs(out - ref))
    # 2e-4 tolerance: fused single-pass variance (E[x^2]-mean^2) vs jnp.var.
    assert jnp.allclose(out, ref, atol=2e-4, rtol=2e-4), f"max abs err {err}"

    print("KERNEL_OK")
</pallas_src>

<mosaic_0001>
module attributes {stable_mosaic.version = 11 : i64} {
  func.func @_conv1_stats_kernel(%arg0: i32, %arg1: i32, %arg2: memref<1x18x18x128xf32, #tpu.memory_space<vmem>>, %arg3: memref<3x3x128x128xf32, #tpu.memory_space<vmem>>, %arg4: memref<1x8x16x128xf32, #tpu.memory_space<vmem>>, %arg5: memref<1x1x2x128xf32, #tpu.memory_space<vmem>>) attributes {dimension_semantics = [#tpu.dimension_semantics<parallel>, #tpu.dimension_semantics<arbitrary>], iteration_bounds = array<i64: 2, 2>, scalar_prefetch = 0 : i64, scratch_operands = 0 : i64, tpu.core_type = #tpu.core_type<tc>, window_params = [{transform_indices = @transform_0, window_bounds = array<i64: 1, 18, 18, 128>}, {pipeline_mode = #tpu.pipeline_mode<synchronous>, transform_indices = @transform_1, window_bounds = array<i64: 3, 3, 128, 128>}, {transform_indices = @transform_2, window_bounds = array<i64: 1, 8, 16, 128>}, {transform_indices = @transform_3, window_bounds = array<i64: 1, 1, 2, 128>}]} {
    %c8_i32 = arith.constant 8 : i32
    %0 = arith.muli %arg1, %c8_i32 : i32
    %1 = tpu.assume_multiple %0, 8 : i32
    %cst = arith.constant 0.000000e+00 : f32
    %2 = vector.broadcast %cst : f32 to vector<128x128xf32>
    %c0_i32 = arith.constant 0 : i32
    %3 = arith.addi %1, %c0_i32 : i32
    %c0 = arith.constant 0 : index
    %4 = arith.index_cast %3 : i32 to index
    %c0_0 = arith.constant 0 : index
    %c0_1 = arith.constant 0 : index
    %5 = vector.load %arg2[%c0, %4, %c0_0, %c0_1] : memref<1x18x18x128xf32, #tpu.memory_space<vmem>>, vector<1x8x18x128xf32>
    %6 = vector.shape_cast %5 : vector<1x8x18x128xf32> to vector<8x18x128xf32>
    %7 = vector.extract_strided_slice %6 {offsets = [0, 0, 0], sizes = [8, 16, 128], strides = [1, 1, 1]} : vector<8x18x128xf32> to vector<8x16x128xf32>
    %8 = vector.shape_cast %7 : vector<8x16x128xf32> to vector<128x128xf32>
    %c0_2 = arith.constant 0 : index
    %c0_3 = arith.constant 0 : index
    %c0_4 = arith.constant 0 : index
    %c0_5 = arith.constant 0 : index
    %9 = vector.load %arg3[%c0_2, %c0_3, %c0_4, %c0_5] : memref<3x3x128x128xf32, #tpu.memory_space<vmem>>, vector<1x1x128x128xf32>
    %10 = vector.shape_cast %9 : vector<1x1x128x128xf32> to vector<128x128xf32>
    %cst_6 = arith.constant dense<0.000000e+00> : vector<128x128xf32>
    %11 = tpu.matmul %8, %10, %cst_6 {dimension_numbers = #tpu.dot_dimension_numbers<[1], [0], [0], [1], [0, 0, 1, 1], [], []>} : vector<128x128xf32>, vector<128x128xf32>, vector<128x128xf32> -> vector<128x128xf32>
    %12 = arith.addf %2, %11 : vector<128x128xf32>
    %13 = vector.extract_strided_slice %6 {offsets = [0, 1, 0], sizes = [8, 16, 128], strides = [1, 1, 1]} : vector<8x18x128xf32> to vector<8x16x128xf32>
    %14 = vector.shape_cast %13 : vector<8x16x128xf32> to vector<128x128xf32>
    %c0_7 = arith.constant 0 : index
    %c1 = arith.constant 1 : index
    %c0_8 = arith.constant 0 : index
    %c0_9 = arith.constant 0 : index
    %15 = vector.load %arg3[%c0_7, %c1, %c0_8, %c0_9] : memref<3x3x128x128xf32, #tpu.memory_space<vmem>>, vector<1x1x128x128xf32>
    %16 = vector.shape_cast %15 : vector<1x1x128x128xf32> to vector<128x128xf32>
    %cst_10 = arith.constant dense<0.000000e+00> : vector<128x128xf32>
    %17 = tpu.matmul %14, %16, %cst_10 {dimension_numbers = #tpu.dot_dimension_numbers<[1], [0], [0], [1], [0, 0, 1, 1], [], []>} : vector<128x128xf32>, vector<128x128xf32>, vector<128x128xf32> -> vector<128x128xf32>
    %18 = arith.addf %12, %17 : vector<128x128xf32>
    %19 = vector.extract_strided_slice %6 {offsets = [0, 2, 0], sizes = [8, 16, 128], strides = [1, 1, 1]} : vector<8x18x128xf32> to vector<8x16x128xf32>
    %20 = vector.shape_cast %19 : vector<8x16x128xf32> to vector<128x128xf32>
    %c0_11 = arith.constant 0 : index
    %c2 = arith.constant 2 : index
    %c0_12 = arith.constant 0 : index
    %c0_13 = arith.constant 0 : index
    %21 = vector.load %arg3[%c0_11, %c2, %c0_12, %c0_13] : memref<3x3x128x128xf32, #tpu.memory_space<vmem>>, vector<1x1x128x128xf32>
    %22 = vector.shape_cast %21 : vector<1x1x128x128xf32> to vector<128x128xf32>
    %cst_14 = arith.constant dense<0.000000e+00> : vector<128x128xf32>
    %23 = tpu.matmul %20, %22, %cst_14 {dimension_numbers = #tpu.dot_dimension_numbers<[1], [0], [0], [1], [0, 0, 1, 1], [], []>} : vector<128x128xf32>, vector<128x128xf32>, vector<128x128xf32> -> vector<128x128xf32>
    %24 = arith.addf %18, %23 : vector<128x128xf32>
    %c1_i32 = arith.constant 1 : i32
    %25 = arith.addi %1, %c1_i32 : i32
    %c0_15 = arith.constant 0 : index
    %26 = arith.index_cast %25 : i32 to index
    %c0_16 = arith.constant 0 : index
    %c0_17 = arith.constant 0 : index
    %27 = vector.load %arg2[%c0_15, %26, %c0_16, %c0_17] : memref<1x18x18x128xf32, #tpu.memory_space<vmem>>, vector<1x8x18x128xf32>
    %28 = vector.shape_cast %27 : vector<1x8x18x128xf32> to vector<8x18x128xf32>
    %29 = vector.extract_strided_slice %28 {offsets = [0, 0, 0], sizes = [8, 16, 128], strides = [1, 1, 1]} : vector<8x18x128xf32> to vector<8x16x128xf32>
    %30 = vector.shape_cast %29 : vector<8x16x128xf32> to vector<128x128xf32>
    %c1_18 = arith.constant 1 : index
    %c0_19 = arith.constant 0 : index
    %c0_20 = arith.constant 0 : index
    %c0_21 = arith.constant 0 : index
    %31 = vector.load %arg3[%c1_18, %c0_19, %c0_20, %c0_21] : memref<3x3x128x128xf32, #tpu.memory_space<vmem>>, vector<1x1x128x128xf32>
    %32 = vector.shape_cast %31 : vector<1x1x128x128xf32> to vector<128x128xf32>
    %cst_22 = arith.constant dense<0.000000e+00> : vector<128x128xf32>
    %33 = tpu.matmul %30, %32, %cst_22 {dimension_numbers = #tpu.dot_dimension_numbers<[1], [0], [0], [1], [0, 0, 1, 1], [], []>} : vector<128x128xf32>, vector<128x128xf32>, vector<128x128xf32> -> vector<128x128xf32>
    %34 = arith.addf %24, %33 : vector<128x128xf32>
    %35 = vector.extract_strided_slice %28 {offsets = [0, 1, 0], sizes = [8, 16, 128], strides = [1, 1, 1]} : vector<8x18x128xf32> to vector<8x16x128xf32>
    %36 = vector.shape_cast %35 : vector<8x16x128xf32> to vector<128x128xf32>
    %c1_23 = arith.constant 1 : index
    %c1_24 = arith.constant 1 : index
    %c0_25 = arith.constant 0 : index
    %c0_26 = arith.constant 0 : index
    %37 = vector.load %arg3[%c1_23, %c1_24, %c0_25, %c0_26] : memref<3x3x128x128xf32, #tpu.memory_space<vmem>>, vector<1x1x128x128xf32>
    %38 = vector.shape_cast %37 : vector<1x1x128x128xf32> to vector<128x128xf32>
    %cst_27 = arith.constant dense<0.000000e+00> : vector<128x128xf32>
    %39 = tpu.matmul %36, %38, %cst_27 {dimension_numbers = #tpu.dot_dimension_numbers<[1], [0], [0], [1], [0, 0, 1, 1], [], []>} : vector<128x128xf32>, vector<128x128xf32>, vector<128x128xf32> -> vector<128x128xf32>
    %40 = arith.addf %34, %39 : vector<128x128xf32>
    %41 = vector.extract_strided_slice %28 {offsets = [0, 2, 0], sizes = [8, 16, 128], strides = [1, 1, 1]} : vector<8x18x128xf32> to vector<8x16x128xf32>
    %42 = vector.shape_cast %41 : vector<8x16x128xf32> to vector<128x128xf32>
    %c1_28 = arith.constant 1 : index
    %c2_29 = arith.constant 2 : index
    %c0_30 = arith.constant 0 : index
    %c0_31 = arith.constant 0 : index
    %43 = vector.load %arg3[%c1_28, %c2_29, %c0_30, %c0_31] : memref<3x3x128x128xf32, #tpu.memory_space<vmem>>, vector<1x1x128x128xf32>
    %44 = vector.shape_cast %43 : vector<1x1x128x128xf32> to vector<128x128xf32>
    %cst_32 = arith.constant dense<0.000000e+00> : vector<128x128xf32>
    %45 = tpu.matmul %42, %44, %cst_32 {dimension_numbers = #tpu.dot_dimension_numbers<[1], [0], [0], [1], [0, 0, 1, 1], [], []>} : vector<128x128xf32>, vector<128x128xf32>, vector<128x128xf32> -> vector<128x128xf32>
    %46 = arith.addf %40, %45 : vector<128x128xf32>
    %c2_i32 = arith.constant 2 : i32
    %47 = arith.addi %1, %c2_i32 : i32
    %c0_33 = arith.constant 0 : index
    %48 = arith.index_cast %47 : i32 to index
    %c0_34 = arith.constant 0 : index
    %c0_35 = arith.constant 0 : index
    %49 = vector.load %arg2[%c0_33, %48, %c0_34, %c0_35] : memref<1x18x18x128xf32, #tpu.memory_space<vmem>>, vector<1x8x18x128xf32>
    %50 = vector.shape_cast %49 : vector<1x8x18x128xf32> to vector<8x18x128xf32>
    %51 = vector.extract_strided_slice %50 {offsets = [0, 0, 0], sizes = [8, 16, 128], strides = [1, 1, 1]} : vector<8x18x128xf32> to vector<8x16x128xf32>
    %52 = vector.shape_cast %51 : vector<8x16x128xf32> to vector<128x128xf32>
    %c2_36 = arith.constant 2 : index
    %c0_37 = arith.constant 0 : index
    %c0_38 = arith.constant 0 : index
    %c0_39 = arith.constant 0 : index
    %53 = vector.load %arg3[%c2_36, %c0_37, %c0_38, %c0_39] : memref<3x3x128x128xf32, #tpu.memory_space<vmem>>, vector<1x1x128x128xf32>
    %54 = vector.shape_cast %53 : vector<1x1x128x128xf32> to vector<128x128xf32>
    %cst_40 = arith.constant dense<0.000000e+00> : vector<128x128xf32>
    %55 = tpu.matmul %52, %54, %cst_40 {dimension_numbers = #tpu.dot_dimension_numbers<[1], [0], [0], [1], [0, 0, 1, 1], [], []>} : vector<128x128xf32>, vector<128x128xf32>, vector<128x128xf32> -> vector<128x128xf32>
    %56 = arith.addf %46, %55 : vector<128x128xf32>
    %57 = vector.extract_strided_slice %50 {offsets = [0, 1, 0], sizes = [8, 16, 128], strides = [1, 1, 1]} : vector<8x18x128xf32> to vector<8x16x128xf32>
    %58 = vector.shape_cast %57 : vector<8x16x128xf32> to vector<128x128xf32>
    %c2_41 = arith.constant 2 : index
    %c1_42 = arith.constant 1 : index
    %c0_43 = arith.constant 0 : index
    %c0_44 = arith.constant 0 : index
    %59 = vector.load %arg3[%c2_41, %c1_42, %c0_43, %c0_44] : memref<3x3x128x128xf32, #tpu.memory_space<vmem>>, vector<1x1x128x128xf32>
    %60 = vector.shape_cast %59 : vector<1x1x128x128xf32> to vector<128x128xf32>
    %cst_45 = arith.constant dense<0.000000e+00> : vector<128x128xf32>
    %61 = tpu.matmul %58, %60, %cst_45 {dimension_numbers = #tpu.dot_dimension_numbers<[1], [0], [0], [1], [0, 0, 1, 1], [], []>} : vector<128x128xf32>, vector<128x128xf32>, vector<128x128xf32> -> vector<128x128xf32>
    %62 = arith.addf %56, %61 : vector<128x128xf32>
    %63 = vector.extract_strided_slice %50 {offsets = [0, 2, 0], sizes = [8, 16, 128], strides = [1, 1, 1]} : vector<8x18x128xf32> to vector<8x16x128xf32>
    %64 = vector.shape_cast %63 : vector<8x16x128xf32> to vector<128x128xf32>
    %c2_46 = arith.constant 2 : index
    %c2_47 = arith.constant 2 : index
    %c0_48 = arith.constant 0 : index
    %c0_49 = arith.constant 0 : index
    %65 = vector.load %arg3[%c2_46, %c2_47, %c0_48, %c0_49] : memref<3x3x128x128xf32, #tpu.memory_space<vmem>>, vector<1x1x128x128xf32>
    %66 = vector.shape_cast %65 : vector<1x1x128x128xf32> to vector<128x128xf32>
    %cst_50 = arith.constant dense<0.000000e+00> : vector<128x128xf32>
    %67 = tpu.matmul %64, %66, %cst_50 {dimension_numbers = #tpu.dot_dimension_numbers<[1], [0], [0], [1], [0, 0, 1, 1], [], []>} : vector<128x128xf32>, vector<128x128xf32>, vector<128x128xf32> -> vector<128x128xf32>
    %68 = arith.addf %62, %67 : vector<128x128xf32>
    %69 = vector.shape_cast %68 : vector<128x128xf32> to vector<8x16x128xf32>
    %c0_51 = arith.constant 0 : index
    %c0_52 = arith.constant 0 : index
    %c0_53 = arith.constant 0 : index
    %c0_54 = arith.constant 0 : index
    %70 = vector.load %arg4[%c0_51, %c0_52, %c0_53, %c0_54] : memref<1x8x16x128xf32, #tpu.memory_space<vmem>>, vector<1x8x16x128xf32>
    %71 = vector.shape_cast %70 : vector<1x8x16x128xf32> to vector<8x16x128xf32>
    %72 = vector.shape_cast %69 : vector<8x16x128xf32> to vector<1x8x16x128xf32>
    tpu.vector_store %arg4[%c0_51, %c0_52, %c0_53, %c0_54], %72 {strides = array<i32>} : memref<1x8x16x128xf32, #tpu.memory_space<vmem>>, vector<1x8x16x128xf32>,
    %cst_55 = arith.constant dense<0.000000e+00> : vector<128xf32>
    %73 = vector.multi_reduction <add>, %68, %cst_55 [0] : vector<128x128xf32> to vector<128xf32>
    %74 = vector.shape_cast %73 : vector<128xf32> to vector<1x128xf32>
    %75 = arith.mulf %68, %68 : vector<128x128xf32>
    %cst_56 = arith.constant dense<0.000000e+00> : vector<128xf32>
    %76 = vector.multi_reduction <add>, %75, %cst_56 [0] : vector<128x128xf32> to vector<128xf32>
    %77 = vector.shape_cast %76 : vector<128xf32> to vector<1x128xf32>
    %78 = tpu.concatenate %74, %77 in 0 : vector<1x128xf32>, vector<1x128xf32> -> vector<2x128xf32>
    %c0_57 = arith.constant 0 : index
    %c0_58 = arith.constant 0 : index
    %c0_59 = arith.constant 0 : index
    %c0_60 = arith.constant 0 : index
    %79 = vector.load %arg5[%c0_57, %c0_58, %c0_59, %c0_60] : memref<1x1x2x128xf32, #tpu.memory_space<vmem>>, vector<1x1x2x128xf32>
    %80 = vector.shape_cast %79 : vector<1x1x2x128xf32> to vector<2x128xf32>
    %81 = vector.shape_cast %78 : vector<2x128xf32> to vector<1x1x2x128xf32>
    tpu.vector_store %arg5[%c0_57, %c0_58, %c0_59, %c0_60], %81 {strides = array<i32>} : memref<1x1x2x128xf32, #tpu.memory_space<vmem>>, vector<1x1x2x128xf32>,
    return
  }
  func.func @transform_0(%arg0: i32, %arg1: i32) -> (i32, i32, i32, i32) {
    %c0_i32 = arith.constant 0 : i32
    %c0_i32_0 = arith.constant 0 : i32
    %c0_i32_1 = arith.constant 0 : i32
    %c0_i32_2 = arith.constant 0 : i32
    return %arg0, %c0_i32, %c0_i32_0, %c0_i32_1 : i32, i32, i32, i32
  }
  func.func @transform_1(%arg0: i32, %arg1: i32) -> (i32, i32, i32, i32) {
    %c0_i32 = arith.constant 0 : i32
    %c0_i32_0 = arith.constant 0 : i32
    %c0_i32_1 = arith.constant 0 : i32
    %c0_i32_2 = arith.constant 0 : i32
    %c0_i32_3 = arith.constant 0 : i32
    return %c0_i32, %c0_i32_0, %c0_i32_1, %c0_i32_2 : i32, i32, i32, i32
  }
  func.func @transform_2(%arg0: i32, %arg1: i32) -> (i32, i32, i32, i32) {
    %c0_i32 = arith.constant 0 : i32
    %c0_i32_0 = arith.constant 0 : i32
    %c0_i32_1 = arith.constant 0 : i32
    return %arg0, %arg1, %c0_i32, %c0_i32_0 : i32, i32, i32, i32
  }
  func.func @transform_3(%arg0: i32, %arg1: i32) -> (i32, i32, i32, i32) {
    %c0_i32 = arith.constant 0 : i32
    %c0_i32_0 = arith.constant 0 : i32
    %c0_i32_1 = arith.constant 0 : i32
    return %arg0, %arg1, %c0_i32, %c0_i32_0 : i32, i32, i32, i32
  }
}

</mosaic_0001>

<bundles_post_ra>
// kernel: tpu_custom_call.1
= control target key start
LH: loop header
LB: loop body
LE: loop exit
PB: predicated region body
PF: predicated region fallthrough
CT: control target
= control target key end

     0   :  { %9 = vsyncpa [#allocation3], 0  ;;  %s3403_s0 = inlined_call_operand.vmem [shape: f32[2,18,18,128], index: 0, kind: input, shape index: {}]   ;;  %s3404_s1 = inlined_call_operand.vmem [shape: f32[3,3,128,128], index: 1, kind: input, shape index: {}]   ;;  %s3405_s2 = inlined_call_operand.hbm [shape: f32[2,16,16,128], index: 2, kind: output, shape index: {0}]   ;;  %s3406_s3 = inlined_call_operand.hbm [shape: f32[2,2,2,128], index: 3, kind: output, shape index: {1}]  }
   0x1   :  { %11 = vsyncpa [#allocation3 + $0x1], 0 }
   0x2   :  { %12 = vsyncpa [#allocation5], 0 }
   0x3   :  { %14 = vsyncpa [#allocation5 + $0x1], 0  ;;  %s2253_s12 = smov 0   ;;  %s2255_s13 = smov 0  }
   0x4   :  { %s2257_s14 = smov 0   ;;  %s2259_s15 = smov 0  }
   0x5   :  { %s2261_s16 = smov 0   ;;  %s2263_s17 = smov 0  }
   0x6   :  { %s2265_s18 = smov 0   ;;  %s2267_s19 = smov 0  }
   0x7 LB: > { %s1775_s20 = sadd.s32 4294967295, %s2229_s19   ;;  %s1776_s21 = sadd.s32 4294967294, %s2229_s19   ;;  %s2229_s19 = sphi %s2267_s19, %s20_s19   ;;  %s2225_s18 = sphi %s2265_s18, %s3417_s18   ;;  %s2221_s17 = sphi %s2263_s17, %s3416_s17   ;;  %s2217_s16 = sphi %s2261_s16, %s3415_s16   ;;  %s2213_s15 = sphi %s2259_s15, %s3414_s15   ;;  %s2209_s14 = sphi %s2257_s14, %s3413_s14   ;;  %s2205_s13 = sphi %s2255_s13, %s3412_s13   ;;  %s2201_s12 = sphi %s2253_s12, %s3411_s12  }
   0x8   : > { %s29_s22 = sadd.s32 1, %s2221_s17  ;;  %s32_s23 = sadd.s32 1, %s2225_s18 }
   0x9   : > { %p30_p0 = scmp.ge.s32.totalorder %s29_s22, 2  ;;  %p98_p1 = scmp.ne.s32.totalorder %s2209_s14, %s2205_s13 }
   0xa   : > { %p99_p2 = scmp.eq.s32.totalorder %s1775_s20, 3  ;;  %p104_p5 = scmp.ne.s32.totalorder %s2205_s13, %s2201_s12 }
   0xb   : > { %s3419_s22 = smov (%p30_p0, %s29_s22), 0  ;;  %s3421_s23 = smov (!%p30_p0, %s32_s23), %s2225_s18 }
   0xc   : > { %s84_s24 = ssub.s32 %s2221_s17, %s3419_s22  ;;  %p2304_p3 = por %p99_p2, %p98_p1 }
   0xd   : > { %p34_p4 = scmp.ge.s32.totalorder %s3421_s23, 2  ;;  %p105_p6 = scmp.eq.s32.totalorder %s1776_s21, 3 }
   0xe   : > { %p1779_p7 = scmp.ge.s32.totalorder %s2229_s19, 1  ;;  %p162_p9 = scmp.lt.s32.totalorder %s2229_s19, 5 }
   0xf   : > { %s3423_s23 = smov (%p34_p4, %s3421_s23), 0  ;;  %p2313_p8 = por %p105_p6, %p104_p5 }
  0x10   : > { %s83_s27 = ssub.s32 %s2225_s18, %s3423_s23  ;;  %s88_s28 = sadd.s32 1, %s2209_s14 }
  0x11   : > { %s85_s29 = sor.u32 %s84_s24, %s83_s27  ;;  %p163_p10 = pnand %p1779_p7, %p162_p9 }
  0x12   : > { %p86_p11 = scmp.eq.s32.totalorder %s85_s29, 0 }
  0x13   : > { %166 = sbr.rel (%p163_p10) target bundleno = 500 (0x1f4), region = 28 }
  0x14   : > { %s2322_s30 = scalar_select %p86_p11, %s2209_s14, %s88_s28  }
  0x18   : > { %v1800_v0 = vld [vmem:[%s3404_s1 + $0xf8] sm:$0xff]  ;;  %v1799_v1 = vld [vmem:[%s3404_s1 + $0xf0] sm:$0xff]  ;;  %v1798_v2 = vld [vmem:[%s3404_s1 + $0xe8] sm:$0xff]  ;;  %p191_p12 = scmp.lt.s32.totalorder %s2217_s16, 1  ;;  %s1784_s10 = smul.u32 192, %s2213_s15  ;;  %vm264_vm0 = vcmask 1046528  }
  0x19   : > { %1976 = vmatpush.msra.mxu1 %v1800_v0  ;;  %1977 = vmatpush.msra.mxu2 %v1800_v0  ;;  %v1797_v3 = vld [vmem:[%s3404_s1 + $0xe0] sm:$0xff]  ;;  %v1796_v4 = vld [vmem:[%s3404_s1 + $0xd8] sm:$0xff]  ;;  %v1795_v5 = vld [vmem:[%s3404_s1 + $0xd0] sm:$0xff]  ;;  %vm468_vm1 = vcmask 1045504   ;;  %s1971_s9 = sshll.u32 %s2217_s16, 1 }
  0x1a   : > { %1978 = vmatpush.msra.mxu3 %v1800_v0  ;;  %338 = vmatpush.msra.mxu0 %v1800_v0  ;;  %s192_s24 = scalar_select %p191_p12, %s2217_s16, 1  ;;  %v1794_v6 = vld [vmem:[%s3404_s1 + $0xc8] sm:$0xff]  ;;  %v1793_v7 = vld [vmem:[%s3404_s1 + $0xc0] sm:$0xff]  ;;  %v1792_v8 = vld [vmem:[%s3404_s1 + $0xb8] sm:$0xff] }
  0x1b   : > { %1979 = vmatpush.msra.mxu1 %v1799_v1  ;;  %1980 = vmatpush.msra.mxu2 %v1799_v1  ;;  %v1791_v9 = vld [vmem:[%s3404_s1 + $0xb0] sm:$0xff]  ;;  %v1790_v10 = vld [vmem:[%s3404_s1 + $0xa8] sm:$0xff]  ;;  %v1789_v11 = vld [vmem:[%s3404_s1 + $0xa0] sm:$0xff] }
  0x1c   : > { %1981 = vmatpush.msra.mxu3 %v1799_v1  ;;  %339 = vmatpush.msra.mxu0 %v1799_v1  ;;  %s2024_s5 = smul.u32 432, %s192_s24  ;;  %v1788_v12 = vld [vmem:[%s3404_s1 + $0x98] sm:$0xff]  ;;  %v1787_v17 = vld [vmem:[%s3404_s1 + $0x90] sm:$0xff]  ;;  %v1786_v24 = vld [vmem:[%s3404_s1 + $0x88] sm:$0xff]  ;;  %s1969_s24 = sshll.u32 %s2217_s16, 5 }
  0x1d   : > { %1982 = vmatpush.msra.mxu1 %v1798_v2  ;;  %1983 = vmatpush.msra.mxu2 %v1798_v2  ;;  %v1785_v27 = vld [vmem:[%s3404_s1 + $0x80] sm:$0xff]  ;;  %v1816_v32 = vld [vmem:[%s3404_s1 + $0x178] sm:$0xff]  ;;  %v1815_v39 = vld [vmem:[%s3404_s1 + $0x170] sm:$0xff] }
  0x1e   : > { %1984 = vmatpush.msra.mxu3 %v1798_v2  ;;  %340 = vmatpush.msra.mxu0 %v1798_v2  ;;  %s195_s21 = scalar_lea.vmem %s3403_s0, %s2024_s5  ;;  %v239_v34 = vld [vmem:[%s3404_s1 + $0x78] sm:$0xff]  ;;  %v238_v41 = vld [vmem:[%s3404_s1 + $0x70] sm:$0xff]  ;;  %v1814_v44 = vld [vmem:[%s3404_s1 + $0x168] sm:$0xff] }
  0x1f   : > { %1985 = vmatpush.msra.mxu1 %v1797_v3  ;;  %1986 = vmatpush.msra.mxu2 %v1797_v3  ;;  %s2363_s4 = scalar_lea.vmem %s195_s21, %s1784_s10  ;;  %v1858_v40 = vld [vmem:[%s3404_s1 + $0x1f8] sm:$0xff]  ;;  %v1857_v45 = vld [vmem:[%s3404_s1 + $0x1f0] sm:$0xff]  ;;  %v237_v47 = vld [vmem:[%s3404_s1 + $0x68] sm:$0xff]  ;;  %s1975_s21 = sshll.u32 %s2213_s15, 4 }
  0x20   : > { %1987 = vmatpush.msra.mxu3 %v1797_v3  ;;  %341 = vmatpush.msra.mxu0 %v1797_v3  ;;  %v2372_v13 = vld [vmem:[%s2363_s4 + $0x30] sm:$0xff]  ;;  %v2375_v14 = vld [vmem:[%s2363_s4 + $0x38] sm:$0xff]  ;;  %v2378_v15 = vld [vmem:[%s2363_s4 + $0x60] sm:$0xff]  ;;  %s1632_s27 = sadd.s32 %s1975_s21, %s1969_s24 }
  0x21   : > { %1988 = vmatpush.msra.mxu1 %v1796_v4  ;;  %1989 = vmatpush.msra.mxu2 %v1796_v4  ;;  %v2381_v16 = vld [vmem:[%s2363_s4 + $0x68] sm:$0xff]  ;;  %v2387_v18 = vld [vmem:[%s2363_s4 + $0x90] sm:$0xff]  ;;  %v2390_v19 = vld [vmem:[%s2363_s4 + $0x98] sm:$0xff]  ;;  %v275_v20 = vrot.slane %v2372_v13, 1  ;;  %v2394_v21 = vrot.slane %v2375_v14, 1  ;;  %v285_v22 = vrot.slane %v2378_v15, 1 }
  0x22   : > { %1990 = vmatpush.msra.mxu3 %v1796_v4  ;;  %342 = vmatpush.msra.mxu0 %v1796_v4  ;;  %v2398_v23 = vrot.slane %v2381_v16, 1  ;;  %v295_v25 = vrot.slane %v2387_v18, 1  ;;  %v2405_v26 = vrot.slane %v2390_v19, 1  ;;  %v2411_v28 = vld [vmem:[%s2363_s4] sm:$0xff]  ;;  %v2414_v29 = vld [vmem:[%s2363_s4 + $0x8] sm:$0xff]  ;;  %v1812_v55 = vld [vmem:[%s3404_s1 + $0x158] sm:$0xff] }
  0x23   : > { %1991 = vmatpush.msra.mxu1 %v1795_v5  ;;  %1992 = vmatpush.msra.mxu2 %v1795_v5  ;;  %v2418_v30 = vsel %vm264_vm0, %v275_v20, %v2394_v21  ;;  %v2428_v33 = vld [vmem:[%s2363_s4 + $0x70] sm:$0x3]  ;;  %v2438_v36 = vld [vmem:[%s2363_s4 + $0x40] sm:$0x3]  ;;  %v265_v37 = vrot.slane %v2411_v28, 1  ;;  %v266_v38 = vrot.slane %v2414_v29, 1 }
  0x24   : > { %1993 = vmatpush.msra.mxu3 %v1795_v5  ;;  %343 = vmatpush.msra.mxu0 %v1795_v5  ;;  %v2422_v31 = vsel %vm264_vm0, %v285_v22, %v2398_v23  ;;  %v2435_v35 = vsel %vm264_vm0, %v295_v25, %v2405_v26  ;;  %v288_v42 = vrot.slane %v2428_v33, 1  ;;  %v2455_v43 = vld [vmem:[%s2363_s4 + $0xa0] sm:$0x3]  ;;  %v278_v46 = vrot.slane %v2438_v36, 1  ;;  %v1856_v50 = vld [vmem:[%s3404_s1 + $0x1e8] sm:$0xff]  ;;  %v235_v57 = vld [vmem:[%s3404_s1 + $0x58] sm:$0xff] }
  0x25   : > { %1994 = vmatpush.msra.mxu1 %v1794_v6  ;;  %1995 = vmatpush.msra.mxu2 %v1794_v6  ;;  %v267_v48 = vsel %vm264_vm0, %v265_v37, %v266_v38  ;;  %v1813_v49 = vld [vmem:[%s3404_s1 + $0x160] sm:$0xff]  ;;  %v298_v51 = vrot.slane %v2455_v43, 1  ;;  %v2495_v58 = vld [vmem:[%s2363_s4 + $0x78] sm:$0xff]  ;;  %v1811_v61 = vld [vmem:[%s3404_s1 + $0x150] sm:$0xff]  ;;  %s1970_s28 = sshll.u32 %s1632_s27, 3 }
  0x26   : > { %1996 = vmatpush.msra.mxu3 %v1794_v6  ;;  %344 = vmatpush.msra.mxu0 %v1794_v6  ;;  %v236_v52 = vld [vmem:[%s3404_s1 + $0x60] sm:$0xff]  ;;  %v289_v53 = vsel %vm264_vm0, %v2398_v23, %v288_v42  ;;  %v279_v54 = vsel %vm264_vm0, %v2394_v21, %v278_v46  ;;  %v2506_v62 = vld [vmem:[%s2363_s4 + $0x48] sm:$0xff]  ;;  %v2509_v63 = vld [vmem:[%s2363_s4 + $0x50] sm:$0xff]  ;;  %v290_v5 = vrot.slane %v2495_v58, 1  ;;  %s1634_s6 = scalar_lea.hbm %s3405_s2, %s1970_s28  ;;  %s2123_s28 = scalar_lea.hbm %s3405_s2, 512 }
  0x27   : > { %1997 = vmatpush.msra.mxu1 %v1793_v7  ;;  %1998 = vmatpush.msra.mxu2 %v1793_v7  ;;  %v1855_v56 = vld [vmem:[%s3404_s1 + $0x1e0] sm:$0xff]  ;;  %v299_v60 = vsel %vm264_vm0, %v2405_v26, %v298_v51  ;;  %v1854_v0 = vld [vmem:[%s3404_s1 + $0x1d8] sm:$0xff]  ;;  %v234_v2 = vld [vmem:[%s3404_s1 + $0x50] sm:$0xff]  ;;  %s1637_s8 = sshll.u32 %s1634_s6, 4  ;;  %s1638_s8 = int_to_ptr.hbm [resolvable:$true] %s1637_s8 }
  0x28   : > { %1999 = vmatpush.msra.mxu3 %v1793_v7  ;;  %345 = vmatpush.msra.mxu0 %v1793_v7  ;;  %v2498_v59 = vld [vmem:[%s2363_s4 + $0x80] sm:$0xff]  ;;  %v1874_v1 = vld [vmem:[%s3404_s1 + $0x278] sm:$0xff]  ;;  %v1810_v3 = vld [vmem:[%s3404_s1 + $0x148] sm:$0xff] }
  0x29   : > { %2000 = vmatpush.msra.mxu1 %v1792_v8  ;;  %2001 = vmatpush.msra.mxu2 %v1792_v8  ;;  %v1853_v4 = vld [vmem:[%s3404_s1 + $0x1d0] sm:$0xff]  ;;  %v2528_v6 = vrot.slane %v2498_v59, 1  ;;  %v1809_v20 = vld [vmem:[%s3404_s1 + $0x140] sm:$0xff]  ;;  %v1852_v22 = vld [vmem:[%s3404_s1 + $0x1c8] sm:$0xff] }
  0x2a   : > { %2002 = vmatpush.msra.mxu3 %v1792_v8  ;;  %346 = vmatpush.msra.mxu0 %v1792_v8  ;;  %v2531_v7 = vld [vmem:[%s2363_s4 + $0x10] sm:$0x3]  ;;  %v1871_v42 = vld [vmem:[%s3404_s1 + $0x260] sm:$0xff]  ;;  %v2591_v46 = vld [vmem:[%s2363_s4 + $0x88] sm:$0x3] }
  0x2b   : > { %2003 = vmatpush.msra.mxu1 %v1791_v9  ;;  %2004 = vmatpush.msra.mxu2 %v1791_v9  ;;  %v1873_v8 = vld [vmem:[%s3404_s1 + $0x270] sm:$0xff]  ;;  %v268_v25 = vrot.slane %v2531_v7, 1 }
  0x2c   : > { %2005 = vmatpush.msra.mxu3 %v1791_v9  ;;  %347 = vmatpush.msra.mxu0 %v1791_v9  ;;  %v280_v9 = vrot.slane %v2506_v62, 1  ;;  %v230_v51 = vld [vmem:[%s3404_s1 + $0x30] sm:$0xff] }
  0x2d   : > { %2006 = vmatpush.msra.mxu1 %v1790_v10  ;;  %2007 = vmatpush.msra.mxu2 %v1790_v10 }
  0x2e   : > { %2008 = vmatpush.msra.mxu3 %v1790_v10  ;;  %348 = vmatpush.msra.mxu0 %v1790_v10  ;;  %v2538_v10 = vrot.slane %v2509_v63, 1 }
  0x2f   : > { %2009 = vmatpush.msra.mxu1 %v1789_v11  ;;  %2010 = vmatpush.msra.mxu2 %v1789_v11 }
  0x30   : > { %2011 = vmatpush.msra.mxu3 %v1789_v11  ;;  %349 = vmatpush.msra.mxu0 %v1789_v11  ;;  %v2541_v11 = vld [vmem:[%s2363_s4 + $0xa8] sm:$0xff] }
  0x31   : > { %2012 = vmatpush.msra.mxu1 %v1788_v12  ;;  %2013 = vmatpush.msra.mxu2 %v1788_v12 }
  0x32   : > { %2014 = vmatpush.msra.mxu3 %v1788_v12  ;;  %350 = vmatpush.msra.mxu0 %v1788_v12  ;;  %v2544_v12 = vld [vmem:[%s2363_s4 + $0xb0] sm:$0xff] }
  0x33   : > { %2015 = vmatpush.msra.mxu1 %v1787_v17  ;;  %2016 = vmatpush.msra.mxu2 %v1787_v17  ;;  %v2568_v37 = vrot.slane %v2544_v12, 1 }
  0x34   : > { %2017 = vmatpush.msra.mxu3 %v1787_v17  ;;  %351 = vmatpush.msra.mxu0 %v1787_v17  ;;  %v233_v17 = vld [vmem:[%s3404_s1 + $0x48] sm:$0xff] }
  0x35   : > { %2018 = vmatpush.msra.mxu1 %v1786_v24  ;;  %2019 = vmatpush.msra.mxu2 %v1786_v24 }
  0x36   : > { %2020 = vmatpush.msra.mxu3 %v1786_v24  ;;  %352 = vmatpush.msra.mxu0 %v1786_v24  ;;  %v1872_v24 = vld [vmem:[%s3404_s1 + $0x268] sm:$0xff] }
  0x37   : > { %2021 = vmatpush.msra.mxu1 %v1785_v27  ;;  %2022 = vmatpush.msra.mxu2 %v1785_v27 }
  0x38   : > { %366 = vmatmul.f32.vlgmr.msra.gmra.mxu1 %v2418_v30  ;;  %378 = vmatmul.f32.vlgmr.msra.gmra.mxu2 %v2422_v31 }
  0x39   : > { %542 = vmatpush.msrb.mxu2 %v1816_v32  ;;  %2023 = vmatpush.msra.mxu3 %v1785_v27  ;;  %v2564_v32 = vsel %vm264_vm0, %v290_v5, %v2528_v6 }
  0x3a   : > { %403 = vmatpush.msrb.mxu1 %v239_v34  ;;  %390 = vmatmul.f32.vlgmr.msra.gmra.mxu3 %v2435_v35  ;;  %v300_v34 = vrot.slane %v2541_v11, 1 }
  0x3b   : > { %543 = vmatpush.msrb.mxu2 %v1815_v39  ;;  %667 = vmatpush.msrb.mxu3 %v1858_v40  ;;  %v2572_v39 = vsel %vm264_vm0, %v280_v9, %v2538_v10  ;;  %v1808_v40 = vld [vmem:[%s3404_s1 + $0x138] sm:$0xff] }
  0x3c   : > { %404 = vmatpush.msrb.mxu1 %v238_v41  ;;  %353 = vmatpush.msra.mxu0 %v1785_v27  ;;  %v232_v27 = vld [vmem:[%s3404_s1 + $0x40] sm:$0xff] }
  0x3d   : > { %544 = vmatpush.msrb.mxu2 %v1814_v44  ;;  %668 = vmatpush.msrb.mxu3 %v1857_v45  ;;  %v1851_v41 = vld [vmem:[%s3404_s1 + $0x1c0] sm:$0xff]  ;;  %v231_v44 = vld [vmem:[%s3404_s1 + $0x38] sm:$0xff]  ;;  %v269_v45 = vsel %vm264_vm0, %v266_v38, %v268_v25 }
  0x3e   : > { %405 = vmatpush.msrb.mxu1 %v237_v47  ;;  %354 = vmatmul.f32.vlgmr.msra.gmra.mxu0 %v267_v48  ;;  %v2596_v47 = vsel %vm264_vm0, %v300_v34, %v2568_v37  ;;  %v1807_v48 = vld [vmem:[%s3404_s1 + $0x130] sm:$0xff]  ;;  %v1850_v38 = vld [vmem:[%s3404_s1 + $0x1b8] sm:$0xff]  ;;  %v1867_v25 = vld [vmem:[%s3404_s1 + $0x240] sm:$0xff] }
  0x3f   : > { %545 = vmatpush.msrb.mxu2 %v1813_v49  ;;  %669 = vmatpush.msrb.mxu3 %v1856_v50  ;;  %v2602_v49 = vld [vmem:[%s2363_s4 + $0x58] sm:$0x3] }
  0x40   : > { %406 = vmatpush.msrb.mxu1 %v236_v52  ;;  %381 = vmatmul.f32.gmra.mxu2 %v289_v53  ;;  %v1870_v50 = vld [vmem:[%s3404_s1 + $0x258] sm:$0xff]  ;;  %v1806_v52 = vld [vmem:[%s3404_s1 + $0x128] sm:$0xff]  ;;  %v293_v53 = vrot.slane %v2591_v46, 1 }
  0x41   : > { %369 = vmatmul.f32.gmra.mxu1 %v279_v54  ;;  %546 = vmatpush.msrb.mxu2 %v1812_v55  ;;  %v2618_v54 = vld [vmem:[%s2363_s4 + $0x18] sm:$0xff]  ;;  %v2621_v55 = vld [vmem:[%s2363_s4 + $0x20] sm:$0xff] }
  0x42   : > { %670 = vmatpush.msrb.mxu3 %v1855_v56  ;;  %407 = vmatpush.msrb.mxu1 %v235_v57  ;;  %v1849_v56 = vld [vmem:[%s3404_s1 + $0x1b0] sm:$0xff]  ;;  %v2648_v5 = vrot.slane %v2621_v55, 1  ;;  %v294_v9 = vsel %vm264_vm0, %v2528_v6, %v293_v53 }
  0x43   : > { %393 = vmatmul.f32.gmra.mxu3 %v299_v60  ;;  %547 = vmatpush.msrb.mxu2 %v1811_v61  ;;  %v1869_v57 = vld [vmem:[%s3404_s1 + $0x250] sm:$0xff]  ;;  %v283_v60 = vrot.slane %v2602_v49, 1  ;;  %v2632_v61 = vld [vmem:[%s2363_s4 + $0xb8] sm:$0x3] }
  0x44   : > { %671 = vmatpush.msrb.mxu3 %v1854_v0  ;;  %845 = vmatpush.msrb.mxu0 %v1874_v1  ;;  %v229_v0 = vld [vmem:[%s3404_s1 + $0x28] sm:$0xff]  ;;  %v1805_v1 = vld [vmem:[%s3404_s1 + $0x120] sm:$0xff]  ;;  %v1865_v53 = vld [vmem:[%s3404_s1 + $0x230] sm:$0xff] }
  0x45   : > { %408 = vmatpush.msrb.mxu1 %v234_v2  ;;  %548 = vmatpush.msrb.mxu2 %v1810_v3  ;;  %v1848_v2 = vld [vmem:[%s3404_s1 + $0x1a8] sm:$0xff] }
  0x46   : > { %672 = vmatpush.msrb.mxu3 %v1853_v4  ;;  %846 = vmatpush.msrb.mxu0 %v1873_v8  ;;  %v1868_v3 = vld [vmem:[%s3404_s1 + $0x248] sm:$0xff]  ;;  %v270_v4 = vrot.slane %v2618_v54, 1  ;;  %v228_v8 = vld [vmem:[%s3404_s1 + $0x20] sm:$0xff] }
  0x47   : > { %409 = vmatpush.msrb.mxu1 %v233_v17  ;;  %549 = vmatpush.msrb.mxu2 %v1809_v20  ;;  %v303_v17 = vrot.slane %v2632_v61, 1  ;;  %v284_v20 = vsel %vm264_vm0, %v2538_v10, %v283_v60  ;;  %v1844_v60 = vld [vmem:[%s3404_s1 + $0x188] sm:$0xff] }
  0x48   : > { %673 = vmatpush.msrb.mxu3 %v1852_v22  ;;  %847 = vmatpush.msrb.mxu0 %v1872_v24  ;;  %v1804_v22 = vld [vmem:[%s3404_s1 + $0x118] sm:$0xff]  ;;  %v1847_v24 = vld [vmem:[%s3404_s1 + $0x1a0] sm:$0xff]  ;;  %v2672_v34 = vsel %vm264_vm0, %v270_v4, %v2648_v5 }
  0x49   : > { %410 = vmatpush.msrb.mxu1 %v232_v27  ;;  %384 = vmatmul.f32.gmra.mxu2 %v2564_v32  ;;  %v227_v27 = vld [vmem:[%s3404_s1 + $0x18] sm:$0xff]  ;;  %v1843_v4 = vld [vmem:[%s3404_s1 + $0x180] sm:$0xff] }
  0x4a   : > { %372 = vmatmul.f32.gmra.mxu1 %v2572_v39  ;;  %550 = vmatpush.msrb.mxu2 %v1808_v40  ;;  %v304_v40 = vsel %vm264_vm0, %v2568_v37, %v303_v17 }
  0x4b   : > { %674 = vmatpush.msrb.mxu3 %v1851_v41  ;;  %848 = vmatpush.msrb.mxu0 %v1871_v42  ;;  %v1803_v41 = vld [vmem:[%s3404_s1 + $0x110] sm:$0xff]  ;;  %v1846_v42 = vld [vmem:[%s3404_s1 + $0x198] sm:$0xff] }
  0x4c   : > { %411 = vmatpush.msrb.mxu1 %v231_v44  ;;  %357 = vmatmul.f32.gmra.mxu0 %v269_v45  ;;  %v1866_v44 = vld [vmem:[%s3404_s1 + $0x238] sm:$0xff]  ;;  %v226_v45 = vld [vmem:[%s3404_s1 + $0x10] sm:$0xff] }
  0x4d   : > { %396 = vmatmul.f32.gmra.mxu3 %v2596_v47  ;;  %551 = vmatpush.msrb.mxu2 %v1807_v48  ;;  %v1802_v48 = vld [vmem:[%s3404_s1 + $0x108] sm:$0xff] }
  0x4e   : > { %675 = vmatpush.msrb.mxu3 %v1850_v38  ;;  %849 = vmatpush.msrb.mxu0 %v1870_v50  ;;  %v469_v38 = vrot.slane %v2411_v28, 2  ;;  %v470_v50 = vrot.slane %v2414_v29, 2 }
  0x4f   : > { %412 = vmatpush.msrb.mxu1 %v230_v51  ;;  %552 = vmatpush.msrb.mxu2 %v1806_v52  ;;  %v2695_v51 = vld [vmem:[%s2363_s4 + $0x28] sm:$0x3]  ;;  %v1845_v52 = vld [vmem:[%s3404_s1 + $0x190] sm:$0xff] }
  0x50   : > { %676 = vmatpush.msrb.mxu3 %v1849_v56  ;;  %850 = vmatpush.msrb.mxu0 %v1869_v57  ;;  %v225_v56 = vld [vmem:[%s3404_s1 + $0x8] sm:$0xff]  ;;  %v1801_v57 = vld [vmem:[%s3404_s1 + $0x100] sm:$0xff] }
  0x51   : > { %413 = vmatpush.msrb.mxu1 %v229_v0  ;;  %553 = vmatpush.msrb.mxu2 %v1805_v1  ;;  %v1864_v0 = vld [vmem:[%s3404_s1 + $0x228] sm:$0xff]  ;;  %v273_v1 = vrot.slane %v2695_v51, 1 }
  0x52   : > { %677 = vmatpush.msrb.mxu3 %v1848_v2  ;;  %851 = vmatpush.msrb.mxu0 %v1868_v3  ;;  %v224_v2 = vld [vmem:[%s3404_s1] sm:$0xff]  ;;  %v471_v3 = vsel %vm468_vm1, %v469_v38, %v470_v50  ;;  %v1888_v38 = vld [vmem:[%s3404_s1 + $0x2e8] sm:$0xff] }
  0x53   : > { %414 = vmatpush.msrb.mxu1 %v228_v8  ;;  %387 = vmatmul.f32.gmra.mxu2 %v294_v9  ;;  %v1863_v8 = vld [vmem:[%s3404_s1 + $0x220] sm:$0xff]  ;;  %v1932_v9 = vld [vmem:[%s3404_s1 + $0x378] sm:$0xff]  ;;  %v274_v17 = vsel %vm264_vm0, %v2648_v5, %v273_v1 }
  0x54   : > { %375 = vmatmul.f32.gmra.mxu1 %v284_v20  ;;  %554 = vmatpush.msrb.mxu2 %v1804_v22  ;;  %v1862_v20 = vld [vmem:[%s3404_s1 + $0x218] sm:$0xff] }
  0x55   : > { %678 = vmatpush.msrb.mxu3 %v1847_v24  ;;  %852 = vmatpush.msrb.mxu0 %v1867_v25  ;;  %v1948_v22 = vld [vmem:[%s3404_s1 + $0x3f8] sm:$0xff]  ;;  %v472_v24 = vrot.slane %v2531_v7, 2  ;;  %v1947_v7 = vld [vmem:[%s3404_s1 + $0x3f0] sm:$0xff] }
  0x56   : > { %415 = vmatpush.msrb.mxu1 %v227_v27  ;;  %360 = vmatmul.f32.gmra.mxu0 %v2672_v34  ;;  %v1890_v25 = vld [vmem:[%s3404_s1 + $0x2f8] sm:$0xff]  ;;  %v1861_v27 = vld [vmem:[%s3404_s1 + $0x210] sm:$0xff] }
  0x57   : > { %399 = vmatmul.f32.gmra.mxu3 %v304_v40  ;;  %555 = vmatpush.msrb.mxu2 %v1803_v41  ;;  %v1889_v40 = vld [vmem:[%s3404_s1 + $0x2f0] sm:$0xff]  ;;  %v1930_v41 = vld [vmem:[%s3404_s1 + $0x368] sm:$0xff]  ;;  %v1928_v1 = vld [vmem:[%s3404_s1 + $0x358] sm:$0xff] }
  0x58   : > { %679 = vmatpush.msrb.mxu3 %v1846_v42  ;;  %853 = vmatpush.msrb.mxu0 %v1866_v44  ;;  %v1860_v42 = vld [vmem:[%s3404_s1 + $0x208] sm:$0xff]  ;;  %v473_v44 = vsel %vm468_vm1, %v470_v50, %v472_v24  ;;  %v926_v50 = vrot.slane %v2618_v54, 2  ;;  %v477_v24 = vrot.slane %v2695_v51, 2  ;;  %v1959_v51 = vld [vmem:[%s3404_s1 + $0x450] sm:$0xff] }
  0x59   : > { %416 = vmatpush.msrb.mxu1 %v226_v45  ;;  %556 = vmatpush.msrb.mxu2 %v1802_v48  ;;  %v1946_v45 = vld [vmem:[%s3404_s1 + $0x3e8] sm:$0xff]  ;;  %v1859_v48 = vld [vmem:[%s3404_s1 + $0x200] sm:$0xff] }
  0x5a   : > { %680 = vmatpush.msrb.mxu3 %v1845_v52  ;;  %854 = vmatpush.msrb.mxu0 %v1865_v53  ;;  %v2774_v52 = vrot.slane %v2621_v55, 2  ;;  %v1964_v53 = vld [vmem:[%s3404_s1 + $0x478] sm:$0xff] }
  0x5b   : > { %417 = vmatpush.msrb.mxu1 %v225_v56  ;;  %557 = vmatpush.msrb.mxu2 %v1801_v57  ;;  %v2780_v56 = vld [vmem:[%s2363_s4 + $0x28] sm:$0x3]  ;;  %v1929_v57 = vld [vmem:[%s3404_s1 + $0x360] sm:$0xff] }
  0x5c   : > { %681 = vmatpush.msrb.mxu3 %v1844_v60  ;;  %855 = vmatpush.msrb.mxu0 %v1864_v0  ;;  %v1887_v60 = vld [vmem:[%s3404_s1 + $0x2e0] sm:$0xff]  ;;  %v1963_v0 = vld [vmem:[%s3404_s1 + $0x470] sm:$0xff] }
  0x5d   : > { %418 = vmatpush.msrb.mxu1 %v224_v2  ;;  %558 = vmatmul.f32.vlgmr.msrb.gmra.mxu2 %v471_v3  ;;  %v775_v2 = vrot.slane %v2780_v56, 1  ;;  %v1944_v3 = vld [vmem:[%s3404_s1 + $0x3d8] sm:$0xff] }
  0x5e   : > { %419 = vmatmul.f32.vlgmr.msrb.gmra.mxu1 %v2411_v28  ;;  %682 = vmatpush.msrb.mxu3 %v1843_v4  ;;  %v1931_v28 = vld [vmem:[%s3404_s1 + $0x370] sm:$0xff]  ;;  %v2808_v4 = vsel %vm468_vm1, %v926_v50, %v2774_v52 }
  0x5f   : > { %856 = vmatpush.msrb.mxu0 %v1863_v8  ;;  %1124 = vmatpush.msra.mxu2 %v1932_v9  ;;  %v1962_v8 = vld [vmem:[%s3404_s1 + $0x468] sm:$0xff]  ;;  %v1927_v9 = vld [vmem:[%s3404_s1 + $0x350] sm:$0xff] }
  0x60   : > { %363 = vmatmul.f32.gmra.mxu0 %v274_v17  ;;  %683 = vmatmul.f32.vlgmr.msrb.gmra.mxu3 %v2618_v54  ;;  %v1961_v17 = vld [vmem:[%s3404_s1 + $0x460] sm:$0xff] }
  0x61   : > { %857 = vmatpush.msrb.mxu0 %v1862_v20  ;;  %1302 = vmatpush.msra.mxu3 %v1948_v22  ;;  %v1943_v20 = vld [vmem:[%s3404_s1 + $0x3d0] sm:$0xff]  ;;  %v776_v22 = vsel %vm264_vm0, %v2648_v5, %v775_v2  ;;  %v1926_v5 = vld [vmem:[%s3404_s1 + $0x348] sm:$0xff] }
  0x62   : > { %999 = vmatpush.msra.mxu1 %v1890_v25  ;;  %1125 = vmatpush.msra.mxu2 %v1931_v28  ;;  %v1960_v25 = vld [vmem:[%s3404_s1 + $0x458] sm:$0xff]  ;;  %v1885_v28 = vld [vmem:[%s3404_s1 + $0x2d0] sm:$0xff] }
  0x63   : > { %858 = vmatpush.msrb.mxu0 %v1861_v27  ;;  %1303 = vmatpush.msra.mxu3 %v1947_v7  ;;  %v1884_v27 = vld [vmem:[%s3404_s1 + $0x2c8] sm:$0xff]  ;;  %v478_v7 = vsel %vm468_vm1, %v2774_v52, %v477_v24  ;;  %v1923_v2 = vld [vmem:[%s3404_s1 + $0x330] sm:$0xff] }
  0x64   : > { %1000 = vmatpush.msra.mxu1 %v1889_v40  ;;  %1126 = vmatpush.msra.mxu2 %v1930_v41  ;;  %v931_v40 = vrot.slane %v2372_v13, 2  ;;  %v2851_v41 = vrot.slane %v2375_v14, 2  ;;  %v1938_v24 = vld [vmem:[%s3404_s1 + $0x3a8] sm:$0xff] }
  0x65   : > { %859 = vmatpush.msrb.mxu0 %v1860_v42  ;;  %561 = vmatmul.f32.gmra.mxu2 %v473_v44  ;;  %v2854_v42 = vld [vmem:[%s2363_s4 + $0x40] sm:$0x3] }
  0x66   : > { %422 = vmatmul.f32.gmra.mxu1 %v2414_v29  ;;  %1304 = vmatpush.msra.mxu3 %v1946_v45  ;;  %v1945_v29 = vld [vmem:[%s3404_s1 + $0x3e0] sm:$0xff]  ;;  %v2873_v50 = vsel %vm468_vm1, %v931_v40, %v2851_v41  ;;  %v1954_v40 = vld [vmem:[%s3404_s1 + $0x428] sm:$0xff] }
  0x67   : > { %860 = vmatpush.msrb.mxu0 %v1859_v48  ;;  %1001 = vmatpush.msra.mxu1 %v1888_v38  ;;  %v1925_v44 = vld [vmem:[%s3404_s1 + $0x340] sm:$0xff]  ;;  %v780_v38 = vrot.slane %v2854_v42, 1 }
  0x68   : > { %686 = vmatmul.f32.gmra.mxu3 %v2621_v55  ;;  %861 = vmatmul.f32.vlgmr.msrb.gmra.mxu0 %v2672_v34  ;;  %v1886_v34 = vld [vmem:[%s3404_s1 + $0x2d8] sm:$0xff]  ;;  %v1941_v45 = vld [vmem:[%s3404_s1 + $0x3c0] sm:$0xff] }
  0x69   : > { %1456 = vmatpush.msra.mxu0 %v1964_v53  ;;  %1127 = vmatpush.msra.mxu2 %v1929_v57  ;;  %v1883_v48 = vld [vmem:[%s3404_s1 + $0x2c0] sm:$0xff]  ;;  %v482_v53 = vrot.slane %v2438_v36, 2  ;;  %v1924_v57 = vld [vmem:[%s3404_s1 + $0x338] sm:$0xff] }
  0x6a   : > { %1305 = vmatpush.msra.mxu3 %v1945_v29  ;;  %1002 = vmatpush.msra.mxu1 %v1887_v60  ;;  %v1940_v29 = vld [vmem:[%s3404_s1 + $0x3b8] sm:$0xff]  ;;  %v936_v60 = vrot.slane %v2506_v62, 2 }
  0x6b   : > { %1457 = vmatpush.msra.mxu0 %v1963_v0  ;;  %1128 = vmatpush.msra.mxu2 %v1928_v1  ;;  %v483_v36 = vsel %vm468_vm1, %v2851_v41, %v482_v53  ;;  %v2898_v0 = vrot.slane %v2509_v63, 2  ;;  %v2901_v1 = vld [vmem:[%s2363_s4 + $0x58] sm:$0x3]  ;;  %v946_v53 = vrot.slane %v2495_v58, 2 }
  0x6c   : > { %1306 = vmatpush.msra.mxu3 %v1944_v3  ;;  %1003 = vmatpush.msra.mxu1 %v1886_v34  ;;  %v1939_v3 = vld [vmem:[%s3404_s1 + $0x3b0] sm:$0xff] }
  0x6d   : > { %564 = vmatmul.f32.gmra.mxu2 %v2808_v4  ;;  %1458 = vmatpush.msra.mxu0 %v1962_v8  ;;  %v1881_v34 = vld [vmem:[%s3404_s1 + $0x2b0] sm:$0xff]  ;;  %v785_v8 = vrot.slane %v2901_v1, 1 }
  0x6e   : > { %425 = vmatmul.f32.gmra.mxu1 %v2618_v54  ;;  %1129 = vmatpush.msra.mxu2 %v1927_v9  ;;  %v1942_v54 = vld [vmem:[%s3404_s1 + $0x3c8] sm:$0xff]  ;;  %v2920_v9 = vsel %vm468_vm1, %v936_v60, %v2898_v0 }
  0x6f   : > { %1459 = vmatpush.msra.mxu0 %v1961_v17  ;;  %1307 = vmatpush.msra.mxu3 %v1943_v20  ;;  %v786_v17 = vsel %vm264_vm0, %v2538_v10, %v785_v8  ;;  %v487_v20 = vrot.slane %v2602_v49, 2  ;;  %v1880_v49 = vld [vmem:[%s3404_s1 + $0x2a8] sm:$0xff] }
  0x70   : > { %689 = vmatmul.f32.gmra.mxu3 %v2372_v13  ;;  %864 = vmatmul.f32.gmra.mxu0 %v776_v22  ;;  %v1922_v22 = vld [vmem:[%s3404_s1 + $0x328] sm:$0xff] }
  0x71   : > { %1460 = vmatpush.msra.mxu0 %v1960_v25  ;;  %1004 = vmatpush.msra.mxu1 %v1885_v28  ;;  %v1955_v25 = vld [vmem:[%s3404_s1 + $0x430] sm:$0xff]  ;;  %v488_v28 = vsel %vm468_vm1, %v2898_v0, %v487_v20  ;;  %v3041_v20 = vrot.slane %v2390_v19, 2 }
  0x72   : > { %1130 = vmatpush.msra.mxu2 %v1926_v5  ;;  %1308 = vmatpush.msra.mxu3 %v1942_v54  ;;  %v941_v5 = vrot.slane %v2378_v15, 2  ;;  %v2945_v54 = vrot.slane %v2381_v16, 2 }
  0x73   : > { %1461 = vmatpush.msra.mxu0 %v1959_v51  ;;  %1005 = vmatpush.msra.mxu1 %v1884_v27  ;;  %v2948_v51 = vld [vmem:[%s2363_s4 + $0x70] sm:$0x3]  ;;  %v1921_v27 = vld [vmem:[%s3404_s1 + $0x320] sm:$0xff] }
  0x74   : > { %1131 = vmatpush.msra.mxu2 %v1925_v44  ;;  %1309 = vmatpush.msra.mxu3 %v1941_v45  ;;  %v1879_v44 = vld [vmem:[%s3404_s1 + $0x2a0] sm:$0xff]  ;;  %v790_v45 = vrot.slane %v2948_v51, 1 }
  0x75   : > { %567 = vmatmul.f32.gmra.mxu2 %v478_v7  ;;  %1006 = vmatpush.msra.mxu1 %v1883_v48  ;;  %v1937_v7 = vld [vmem:[%s3404_s1 + $0x3a0] sm:$0xff]  ;;  %v492_v48 = vrot.slane %v2428_v33, 2 }
  0x76   : > { %428 = vmatmul.f32.gmra.mxu1 %v2621_v55  ;;  %v1958_v55 = vld [vmem:[%s3404_s1 + $0x448] sm:$0xff]  ;;  %1132 = vmatpush.msra.mxu2 %v1924_v57  ;;  %v2992_v57 = vrot.slane %v2498_v59, 2 }
  0x77   : > { %1462 = vmatpush.msra.mxu0 %v1958_v55  ;;  %1310 = vmatpush.msra.mxu3 %v1940_v29  ;;  %v2967_v55 = vsel %vm468_vm1, %v941_v5, %v2945_v54  ;;  %v493_v33 = vsel %vm468_vm1, %v2945_v54, %v492_v48  ;;  %v2995_v29 = vld [vmem:[%s2363_s4 + $0x88] sm:$0x3] }
  0x78   : > { %692 = vmatmul.f32.gmra.mxu3 %v2375_v14  ;;  %867 = vmatmul.f32.gmra.mxu0 %v2418_v30  ;;  %v781_v30 = vsel %vm264_vm0, %v2394_v21, %v780_v38  ;;  %v1957_v21 = vld [vmem:[%s3404_s1 + $0x440] sm:$0xff]  ;;  %v1920_v38 = vld [vmem:[%s3404_s1 + $0x318] sm:$0xff]  ;;  %v795_v60 = vrot.slane %v2995_v29, 1 }
  0x79   : > { %1463 = vmatpush.msra.mxu0 %v1957_v21  ;;  %1133 = vmatpush.msra.mxu2 %v1923_v2  ;;  %v1919_v21 = vld [vmem:[%s3404_s1 + $0x310] sm:$0xff]  ;;  %v3014_v2 = vsel %vm468_vm1, %v946_v53, %v2992_v57 }
  0x7a   : > { %1311 = vmatpush.msra.mxu3 %v1939_v3  ;;  %v497_v3 = vrot.slane %v2591_v46, 2 }
  0x7b   : > { %1134 = vmatpush.msra.mxu2 %v1922_v22  ;;  %v3044_v22 = vld [vmem:[%s2363_s4 + $0xa0] sm:$0x3] }
  0x7c   : > { %1312 = vmatpush.msra.mxu3 %v1938_v24  ;;  %v498_v46 = vsel %vm468_vm1, %v2992_v57, %v497_v3  ;;  %v1917_v24 = vld [vmem:[%s3404_s1 + $0x300] sm:$0xff] }
  0x7d   : > { %570 = vmatmul.f32.gmra.mxu2 %v2873_v50 }
  0x7e   : > { %431 = vmatmul.f32.gmra.mxu1 %v2372_v13  ;;  %v1882_v13 = vld [vmem:[%s3404_s1 + $0x2b8] sm:$0xff]  ;;  %1135 = vmatpush.msra.mxu2 %v1921_v27 }
  0x7f   : > { %1007 = vmatpush.msra.mxu1 %v1882_v13  ;;  %1313 = vmatpush.msra.mxu3 %v1937_v7  ;;  %v1935_v13 = vld [vmem:[%s3404_s1 + $0x390] sm:$0xff] }
  0x80   : > { %695 = vmatmul.f32.gmra.mxu3 %v2506_v62  ;;  %870 = vmatmul.f32.gmra.mxu0 %v781_v30  ;;  %v1936_v30 = vld [vmem:[%s3404_s1 + $0x398] sm:$0xff] }
  0x81   : > { %1008 = vmatpush.msra.mxu1 %v1881_v34  ;;  %1136 = vmatpush.msra.mxu2 %v1920_v38  ;;  %v1934_v34 = vld [vmem:[%s3404_s1 + $0x388] sm:$0xff] }
  0x82   : > { %1314 = vmatpush.msra.mxu3 %v1936_v30  ;;  %v3092_v30 = vld [vmem:[%s2363_s4 + $0xb8] sm:$0x3] }
  0x83   : > { %1009 = vmatpush.msra.mxu1 %v1880_v49  ;;  %1137 = vmatpush.msra.mxu2 %v1919_v21  ;;  %v1875_v49 = vld [vmem:[%s3404_s1 + $0x280] sm:$0xff] }
  0x84   : > { %1315 = vmatpush.msra.mxu3 %v1935_v13  ;;  %v3107_v21 = vld [vmem:[%s2363_s4 + $0xc0] sm:$0xff] }
  0x85   : > { %573 = vmatmul.f32.gmra.mxu2 %v483_v36  ;;  %1010 = vmatpush.msra.mxu1 %v1879_v44  ;;  %v1877_v36 = vld [vmem:[%s3404_s1 + $0x290] sm:$0xff]  ;;  %v502_v44 = vrot.slane %v2455_v43, 2  ;;  %v3087_v43 = vrot.slane %v2544_v12, 2 }
  0x86   : > { %434 = vmatmul.f32.gmra.mxu1 %v2375_v14  ;;  %v1956_v14 = vld [vmem:[%s3404_s1 + $0x438] sm:$0xff]  ;;  %1316 = vmatpush.msra.mxu3 %v1934_v34  ;;  %v1893_v34 = vld [vmem:[%s2363_s4 + $0x30] sm:$0xff] }
  0x87   : > { %1464 = vmatpush.msra.mxu0 %v1956_v14  ;;  %v1918_v14 = vld [vmem:[%s3404_s1 + $0x308] sm:$0xff] }
  0x88   : > { %698 = vmatmul.f32.gmra.mxu3 %v2509_v63  ;;  %873 = vmatmul.f32.gmra.mxu0 %v2572_v39 }
  0x89   : > { %1465 = vmatpush.msra.mxu0 %v1955_v25  ;;  %1138 = vmatpush.msra.mxu2 %v1918_v14  ;;  %v1933_v25 = vld [vmem:[%s3404_s1 + $0x380] sm:$0xff] }
  0x8a   : > { %1317 = vmatpush.msra.mxu3 %v1933_v25 }
  0x8b   : > { %1466 = vmatpush.msra.mxu0 %v1954_v40  ;;  %1139 = vmatpush.msra.mxu2 %v1917_v24 }
  0x8d   : > { %576 = vmatmul.f32.gmra.mxu2 %v2920_v9 }
  0x8e   : > { %437 = vmatmul.f32.gmra.mxu1 %v2506_v62 }
  0x90   : > { %701 = vmatmul.f32.gmra.mxu3 %v2378_v15  ;;  %876 = vmatmul.f32.gmra.mxu0 %v786_v17  ;;  %v951_v17 = vrot.slane %v2387_v18, 2 }
  0x92   : > { %v3063_v5 = vsel %vm468_vm1, %v951_v17, %v3041_v20 }
  0x95   : > { %579 = vmatmul.f32.gmra.mxu2 %v488_v28  ;;  %v800_v28 = vrot.slane %v3044_v22, 1 }
  0x96   : > { %440 = vmatmul.f32.gmra.mxu1 %v2509_v63 }
  0x97   : > { %v801_v27 = vsel %vm264_vm0, %v2405_v26, %v800_v28  ;;  %v503_v26 = vsel %vm468_vm1, %v3041_v20, %v502_v44 }
  0x98   : > { %704 = vmatmul.f32.gmra.mxu3 %v2381_v16  ;;  %879 = vmatmul.f32.gmra.mxu0 %v2422_v31  ;;  %v791_v31 = vsel %vm264_vm0, %v2398_v23, %v790_v45  ;;  %v1953_v23 = vld [vmem:[%s3404_s1 + $0x420] sm:$0xff] }
  0x99   : > { %1467 = vmatpush.msra.mxu0 %v1953_v23 }
  0x9d   : > { %582 = vmatmul.f32.gmra.mxu2 %v2967_v55 }
  0x9e   : > { %443 = vmatmul.f32.gmra.mxu1 %v2378_v15  ;;  %v1878_v15 = vld [vmem:[%s3404_s1 + $0x298] sm:$0xff] }
  0x9f   : > { %1011 = vmatpush.msra.mxu1 %v1878_v15 }
  0xa0   : > { %707 = vmatmul.f32.gmra.mxu3 %v2495_v58  ;;  %882 = vmatmul.f32.gmra.mxu0 %v791_v31  ;;  %v1949_v31 = vld [vmem:[%s3404_s1 + $0x400] sm:$0xff] }
  0xa1   : > { %1012 = vmatpush.msra.mxu1 %v1877_v36 }
  0xa5   : > { %585 = vmatmul.f32.gmra.mxu2 %v493_v33  ;;  %v805_v33 = vrot.slane %v3092_v30, 1 }
  0xa6   : > { %446 = vmatmul.f32.gmra.mxu1 %v2381_v16  ;;  %v1952_v16 = vld [vmem:[%s3404_s1 + $0x418] sm:$0xff] }
  0xa7   : > { %1468 = vmatpush.msra.mxu0 %v1952_v16  ;;  %v806_v13 = vsel %vm264_vm0, %v2568_v37, %v805_v33  ;;  %v3114_v16 = vld [vmem:[%s2363_s4 + $0xc8] sm:$0xff] }
  0xa8   : > { %710 = vmatmul.f32.gmra.mxu3 %v2498_v59  ;;  %885 = vmatmul.f32.gmra.mxu0 %v2564_v32  ;;  %v796_v32 = vsel %vm264_vm0, %v2528_v6, %v795_v60  ;;  %v1951_v6 = vld [vmem:[%s3404_s1 + $0x410] sm:$0xff]  ;;  %v807_v60 = vrot.slane %v3107_v21, 1  ;;  %v3123_v37 = vrot.slane %v3114_v16, 1 }
  0xa9   : > { %1469 = vmatpush.msra.mxu0 %v1951_v6  ;;  %v3136_v6 = vld [vmem:[%s2363_s4 + $0xd0] sm:$0x3] }
  0xaa   : > { %v810_v17 = vrot.slane %v3136_v6, 1 }
  0xad   : > { %588 = vmatmul.f32.gmra.mxu2 %v3014_v2 }
  0xae   : > { %449 = vmatmul.f32.gmra.mxu1 %v2495_v58  ;;  %v1876_v58 = vld [vmem:[%s3404_s1 + $0x288] sm:$0xff] }
  0xaf   : > { %1013 = vmatpush.msra.mxu1 %v1876_v58  ;;  %v1894_v58 = vld [vmem:[%s2363_s4 + $0x38] sm:$0xff] }
  0xb0   : > { %713 = vmatmul.f32.gmra.mxu3 %v2387_v18  ;;  %888 = vmatmul.f32.gmra.mxu0 %v796_v32  ;;  %v1230_v24 = vrot.slane %v1894_v58, 1 }
  0xb1   : > { %1014 = vmatpush.msra.mxu1 %v1875_v49 }
  0xb5   : > { %591 = vmatmul.f32.gmra.mxu2 %v498_v46  ;;  %v3036_v8 = vpop.f32.mrf.mxu1  ;;  %v1229_v46 = vrot.slane %v1893_v34, 1 }
  0xb6   : > { %452 = vmatmul.f32.gmra.mxu1 %v2498_v59  ;;  %v1950_v59 = vld [vmem:[%s3404_s1 + $0x408] sm:$0xff] }
  0xb7   : > { %1470 = vmatpush.msra.mxu0 %v1950_v59  ;;  %v1231_v28 = vsel %vm264_vm0, %v1229_v46, %v1230_v24 }
  0xb8   : > { %716 = vmatmul.f32.gmra.mxu3 %v2390_v19  ;;  %891 = vmatmul.f32.gmra.mxu0 %v2435_v35 }
  0xb9   : > { %1471 = vmatpush.msra.mxu0 %v1949_v31  ;;  %v929_v31 = vrot.slane %v2780_v56, 2 }
  0xbb   : > { %v3065_v35 = vpop.f32.mrf.mxu2  ;;  %v355_v45 = vpop.f32.mrf.mxu0 }
  0xbd   : > { %594 = vmatmul.f32.gmra.mxu2 %v3063_v5  ;;  %v3070_v7 = vpop.f32.mrf.mxu3 }
  0xbe   : > { %455 = vmatmul.f32.gmra.mxu1 %v2387_v18  ;;  %v3073_v40 = vpop.f32.mrf.mxu1  ;;  %v956_v18 = vrot.slane %v2541_v11, 2 }
  0xc0   : > { %719 = vmatmul.f32.gmra.mxu3 %v2541_v11  ;;  %894 = vmatmul.f32.gmra.mxu0 %v801_v27  ;;  %v1895_v27 = vld [vmem:[%s2363_s4 + $0x40] sm:$0x3] }
  0xc3   : > { %v3082_v48 = vpop.f32.mrf.mxu2 }
  0xc5   : > { %597 = vmatmul.f32.gmra.mxu2 %v503_v26 }
  0xc6   : > { %458 = vmatmul.f32.gmra.mxu1 %v2390_v19  ;;  %v3089_v38 = vpop.f32.mrf.mxu3  ;;  %v3101_v19 = vsel %vm468_vm1, %v956_v18, %v3087_v43  ;;  %v1383_v18 = vrot.slane %v1893_v34, 2 }
  0xc7   : > { %v3094_v23 = vpop.f32.mrf.mxu1 }
  0xc8   : > { %722 = vmatmul.f32.gmra.mxu3 %v2544_v12  ;;  %897 = vmatmul.f32.gmra.mxu0 %v2596_v47  ;;  %v507_v47 = vrot.slane %v2632_v61, 2  ;;  %v3129_v61 = vsel %vm264_vm0, %v807_v60, %v3123_v37 }
  0xc9   : > { %v358_v15 = vpop.f32.mrf.mxu0 }
  0xcc   : > { %v3103_v53 = vpop.f32.mrf.mxu2 }
  0xcd   : > { %600 = vmatmul.f32.gmra.mxu2 %v3101_v19 }
  0xce   : > { %461 = vmatmul.f32.gmra.mxu1 %v2541_v11  ;;  %v508_v11 = vsel %vm468_vm1, %v3087_v43, %v507_v47  ;;  %v1384_v47 = vrot.slane %v1894_v58, 2 }
  0xd0   : > { %725 = vmatmul.f32.gmra.mxu3 %v3107_v21  ;;  %900 = vmatmul.f32.gmra.mxu0 %v806_v13  ;;  %v3117_v36 = vpop.f32.mrf.mxu3  ;;  %v1232_v13 = vrot.slane %v1895_v27, 1  ;;  %v1385_v56 = vsel %vm468_vm1, %v1383_v18, %v1384_v47 }
  0xd1   : > { %v3120_v32 = vpop.f32.mrf.mxu1 }
  0xd3   : > { %v361_v3 = vpop.f32.mrf.mxu0 }
  0xd5   : > { %603 = vmatmul.f32.gmra.mxu2 %v508_v11 }
  0xd6   : > { %464 = vmatmul.f32.gmra.mxu1 %v2544_v12  ;;  %v3132_v14 = vpop.f32.mrf.mxu2  ;;  %v811_v12 = vsel %vm264_vm0, %v3123_v37, %v810_v17  ;;  %v930_v17 = vsel %vm468_vm1, %v2774_v52, %v929_v31 }
  0xd8   : > { %728 = vmatmul.f32.gmra.mxu3 %v3114_v16  ;;  %903 = vmatmul.f32.gmra.mxu0 %v3129_v61 }
  0xda   : > { %v3142_v25 = vpop.f32.mrf.mxu3 }
  0xdb   : > { %3409 = vst [vmem:[#allocation8_spill] sm:$0xff] %v3142_v25  ;;  %v420_v59 = vpop.f32.mrf.mxu1 }
  0xdc   : > { %v421_v44 = vadd.f32 %v420_v59, %v355_v45 }
  0xdd   : > { %v364_v49 = vpop.f32.mrf.mxu0  ;;  %1140 = vmatmul.f32.vlgmr.msra.gmra.mxu2 %v1893_v34 }
  0xde   : > { %1015 = vmatmul.f32.vlgmr.msra.gmra.mxu1 %v2808_v4  ;;  %v1233_v4 = vsel %vm264_vm0, %v1230_v24, %v1232_v13  ;;  %v1898_v24 = vld [vmem:[%s2363_s4 + $0x58] sm:$0x3] }
  0xe0   : > { %906 = vmatmul.f32.gmra.mxu0 %v811_v12  ;;  %1318 = vmatmul.f32.vlgmr.msra.gmra.mxu3 %v1231_v28  ;;  %v559_v26 = vpop.f32.mrf.mxu2  ;;  %v1386_v12 = vrot.slane %v1895_v27, 2 }
  0xe1   : > { %v607_v33 = vadd.f32 %v559_v26, %v421_v44  ;;  %v934_v26 = vrot.slane %v2854_v42, 2 }
  0xe3   : > { %v423_v60 = vpop.f32.mrf.mxu1  ;;  %v684_v11 = vpop.f32.mrf.mxu3 }
  0xe4   : > { %v3152_v25 = vadd.f32 %v684_v11, %v607_v33  ;;  %v424_v45 = vadd.f32 %v423_v60, %v358_v15  ;;  %v1237_v33 = vrot.slane %v1898_v24, 1 }
  0xe5   : > { %v3154_v46 = vpop.f32.mrf.mxu0  ;;  %1143 = vmatmul.f32.gmra.mxu2 %v1894_v58  ;;  %v1387_v58 = vsel %vm468_vm1, %v1384_v47, %v1386_v12 }
  0xe6   : > { %1018 = vmatmul.f32.gmra.mxu1 %v930_v17  ;;  %v1238_v42 = vsel %vm264_vm0, %v2538_v10, %v1237_v33 }
  0xe8   : > { %1321 = vmatmul.f32.gmra.mxu3 %v1233_v4  ;;  %1472 = vmatmul.f32.vlgmr.msra.gmra.mxu0 %v1385_v56  ;;  %v562_v34 = vpop.f32.mrf.mxu2 }
  0xe9   : > { %v608_v59 = vadd.f32 %v562_v34, %v424_v45  ;;  %v1391_v45 = vrot.slane %v1898_v24, 2 }
  0xeb   : > { %v426_v28 = vpop.f32.mrf.mxu1  ;;  %v687_v44 = vpop.f32.mrf.mxu3 }
  0xec   : > { %v3158_v52 = vadd.f32 %v687_v44, %v608_v59  ;;  %v427_v15 = vadd.f32 %v426_v28, %v361_v3  ;;  %v1900_v3 = vld [vmem:[%s2363_s4 + $0x68] sm:$0xff]  ;;  %v1901_v28 = vld [vmem:[%s2363_s4 + $0x70] sm:$0x3] }
  0xed   : > { %v3160_v31 = vpop.f32.mrf.mxu0  ;;  %1146 = vmatmul.f32.gmra.mxu2 %v2506_v62  ;;  %v935_v62 = vsel %vm468_vm1, %v2851_v41, %v934_v26  ;;  %v1240_v56 = vrot.slane %v1900_v3, 1 }
  0xee   : > { %1021 = vmatmul.f32.gmra.mxu1 %v2873_v50 }
  0xf0   : > { %1324 = vmatmul.f32.gmra.mxu3 %v2572_v39  ;;  %1475 = vmatmul.f32.gmra.mxu0 %v1387_v58  ;;  %v565_v27 = vpop.f32.mrf.mxu2  ;;  %v1899_v39 = vld [vmem:[%s2363_s4 + $0x60] sm:$0xff]  ;;  %v939_v58 = vrot.slane %v2901_v1, 2 }
  0xf1   : > { %v609_v18 = vadd.f32 %v565_v27, %v427_v15  ;;  %v1239_v41 = vrot.slane %v1899_v39, 1  ;;  %v1393_v15 = vrot.slane %v1899_v39, 2  ;;  %v1242_v27 = vrot.slane %v1901_v28, 1 }
  0xf3   : > { %v429_v13 = vpop.f32.mrf.mxu1  ;;  %v690_v60 = vpop.f32.mrf.mxu3  ;;  %v1241_v10 = vsel %vm264_vm0, %v1239_v41, %v1240_v56  ;;  %v1243_v1 = vsel %vm264_vm0, %v1240_v56, %v1242_v27 }
  0xf4   : > { %v3170_v47 = vadd.f32 %v690_v60, %v609_v18  ;;  %v430_v11 = vadd.f32 %v429_v13, %v364_v49  ;;  %v1392_v49 = vsel %vm468_vm1, %v2898_v0, %v1391_v45  ;;  %v1394_v18 = vrot.slane %v1900_v3, 2 }
  0xf5   : > { %v3172_v50 = vpop.f32.mrf.mxu0  ;;  %1149 = vmatmul.f32.gmra.mxu2 %v2509_v63  ;;  %v940_v60 = vsel %vm468_vm1, %v2898_v0, %v939_v58  ;;  %v1396_v45 = vrot.slane %v1901_v28, 2  ;;  %v944_v58 = vrot.slane %v2948_v51, 2 }
  0xf6   : > { %1024 = vmatmul.f32.gmra.mxu1 %v935_v62 }
  0xf8   : > { %1327 = vmatmul.f32.gmra.mxu3 %v1238_v42  ;;  %1478 = vmatmul.f32.gmra.mxu0 %v2920_v9  ;;  %v568_v17 = vpop.f32.mrf.mxu2  ;;  %v1902_v42 = vld [vmem:[%s2363_s4 + $0x78] sm:$0xff] }
  0xf9   : > { %v610_v4 = vadd.f32 %v568_v17, %v430_v11  ;;  %v1244_v0 = vrot.slane %v1902_v42, 1 }
  0xfb   : > { %v432_v34 = vpop.f32.mrf.mxu1  ;;  %v693_v59 = vpop.f32.mrf.mxu3 }
  0xfc   : > { %v3180_v12 = vadd.f32 %v693_v59, %v610_v4  ;;  %v433_v44 = vadd.f32 %v432_v34, %v3036_v8  ;;  %v1395_v8 = vsel %vm468_vm1, %v1393_v15, %v1394_v18 }
  0xfd   : > { %v3182_v63 = vpop.f32.mrf.mxu0  ;;  %1152 = vmatmul.f32.gmra.mxu2 %v1899_v39  ;;  %v1903_v39 = vld [vmem:[%s2363_s4 + $0x80] sm:$0xff] }
  0xfe   : > { %1027 = vmatmul.f32.gmra.mxu1 %v2920_v9  ;;  %v1245_v41 = vrot.slane %v1903_v39, 1  ;;  %v1399_v27 = vrot.slane %v1903_v39, 2 }
 0x100   : > { %1330 = vmatmul.f32.gmra.mxu3 %v1241_v10  ;;  %1481 = vmatmul.f32.gmra.mxu0 %v1392_v49  ;;  %v571_v24 = vpop.f32.mrf.mxu2  ;;  %v1246_v10 = vsel %vm264_vm0, %v1244_v0, %v1245_v41  ;;  %v1397_v49 = vsel %vm468_vm1, %v1394_v18, %v1396_v45  ;;  %v945_v18 = vsel %vm468_vm1, %v2945_v54, %v944_v58 }
 0x101   : > { %v611_v26 = vadd.f32 %v571_v24, %v433_v44  ;;  %v1398_v24 = vrot.slane %v1902_v42, 2 }
 0x103   : > { %v435_v33 = vpop.f32.mrf.mxu1  ;;  %v696_v13 = vpop.f32.mrf.mxu3 }
 0x104   : > { %v3193_v9 = vadd.f32 %v696_v13, %v611_v26  ;;  %v436_v11 = vadd.f32 %v435_v33, %v3073_v40  ;;  %v1904_v40 = vld [vmem:[%s2363_s4 + $0x88] sm:$0x3] }
 0x105   : > { %v3195_v62 = vpop.f32.mrf.mxu0  ;;  %1155 = vmatmul.f32.gmra.mxu2 %v1900_v3  ;;  %v1247_v26 = vrot.slane %v1904_v40, 1  ;;  %v1401_v0 = vrot.slane %v1904_v40, 2 }
 0x106   : > { %1030 = vmatmul.f32.gmra.mxu1 %v940_v60 }
 0x107   : > { %v1248_v51 = vsel %vm264_vm0, %v1245_v41, %v1247_v26 }
 0x108   : > { %1333 = vmatmul.f32.gmra.mxu3 %v1243_v1  ;;  %1484 = vmatmul.f32.gmra.mxu0 %v1395_v8  ;;  %v574_v17 = vpop.f32.mrf.mxu2  ;;  %v1905_v1 = vld [vmem:[%s2363_s4 + $0x90] sm:$0xff]  ;;  %v1906_v8 = vld [vmem:[%s2363_s4 + $0x98] sm:$0xff] }
 0x109   : > { %v612_v4 = vadd.f32 %v574_v17, %v436_v11  ;;  %v1249_v54 = vrot.slane %v1905_v1, 1  ;;  %v1403_v58 = vrot.slane %v1905_v1, 2 }
 0x10b   : > { %v438_v34 = vpop.f32.mrf.mxu1  ;;  %v699_v59 = vpop.f32.mrf.mxu3 }
 0x10c   : > { %v3202_v3 = vadd.f32 %v699_v59, %v612_v4  ;;  %v439_v44 = vadd.f32 %v438_v34, %v3094_v23  ;;  %v1400_v23 = vsel %vm468_vm1, %v1398_v24, %v1399_v27  ;;  %v1250_v4 = vrot.slane %v1906_v8, 1 }
 0x10d   : > { %v3204_v56 = vpop.f32.mrf.mxu0  ;;  %1158 = vmatmul.f32.gmra.mxu2 %v1902_v42 }
 0x10e   : > { %1033 = vmatmul.f32.gmra.mxu1 %v2967_v55  ;;  %v1251_v59 = vsel %vm264_vm0, %v1249_v54, %v1250_v4 }
 0x110   : > { %1336 = vmatmul.f32.gmra.mxu3 %v1246_v10  ;;  %1487 = vmatmul.f32.gmra.mxu0 %v1397_v49  ;;  %v577_v28 = vpop.f32.mrf.mxu2  ;;  %v1402_v10 = vsel %vm468_vm1, %v1399_v27, %v1401_v0 }
 0x111   : > { %v613_v15 = vadd.f32 %v577_v28, %v439_v44  ;;  %v949_v44 = vrot.slane %v2995_v29, 2 }
 0x113   : > { %v441_v33 = vpop.f32.mrf.mxu1  ;;  %v702_v13 = vpop.f32.mrf.mxu3  ;;  %v950_v27 = vsel %vm468_vm1, %v2992_v57, %v949_v44  ;;  %v954_v44 = vrot.slane %v3044_v22, 2 }
 0x114   : > { %v3214_v55 = vadd.f32 %v702_v13, %v613_v15  ;;  %v442_v42 = vadd.f32 %v441_v33, %v3120_v32  ;;  %v1907_v32 = vld [vmem:[%s2363_s4 + $0xa0] sm:$0x3]  ;;  %v1404_v15 = vrot.slane %v1906_v8, 2 }
 0x115   : > { %v3216_v60 = vpop.f32.mrf.mxu0  ;;  %1161 = vmatmul.f32.gmra.mxu2 %v1903_v39  ;;  %v1252_v24 = vrot.slane %v1907_v32, 1  ;;  %v1406_v54 = vrot.slane %v1907_v32, 2 }
 0x116   : > { %1036 = vmatmul.f32.gmra.mxu1 %v945_v18  ;;  %v1405_v29 = vsel %vm468_vm1, %v1403_v58, %v1404_v15 }
 0x118   : > { %1339 = vmatmul.f32.gmra.mxu3 %v1248_v51  ;;  %1490 = vmatmul.f32.gmra.mxu0 %v1400_v23  ;;  %v580_v11 = vpop.f32.mrf.mxu2  ;;  %v1908_v51 = vld [vmem:[%s2363_s4 + $0xa8] sm:$0xff]  ;;  %v1909_v23 = vld [vmem:[%s2363_s4 + $0xb0] sm:$0xff] }
 0x119   : > { %v614_v17 = vadd.f32 %v580_v11, %v442_v42  ;;  %v1254_v57 = vrot.slane %v1908_v51, 1 }
 0x11b   : > { %v444_v45 = vpop.f32.mrf.mxu1  ;;  %v705_v34 = vpop.f32.mrf.mxu3 }
 0x11c   : > { %v3223_v39 = vadd.f32 %v705_v34, %v614_v17  ;;  %v445_v49 = vadd.f32 %v444_v45, %v3065_v35  ;;  %v1253_v35 = vsel %vm264_vm0, %v1250_v4, %v1252_v24  ;;  %v1255_v17 = vrot.slane %v1909_v23, 1 }
 0x11d   : > { %v3225_v41 = vpop.f32.mrf.mxu0  ;;  %1164 = vmatmul.f32.gmra.mxu2 %v1905_v1  ;;  %v1409_v24 = vrot.slane %v1909_v23, 2 }
 0x11e   : > { %1039 = vmatmul.f32.gmra.mxu1 %v3014_v2  ;;  %v1256_v34 = vsel %vm264_vm0, %v1254_v57, %v1255_v17 }
 0x120   : > { %1342 = vmatmul.f32.gmra.mxu3 %v1251_v59  ;;  %1493 = vmatmul.f32.gmra.mxu0 %v1402_v10  ;;  %v583_v40 = vpop.f32.mrf.mxu2  ;;  %v1407_v59 = vsel %vm468_vm1, %v1404_v15, %v1406_v54  ;;  %v955_v15 = vsel %vm468_vm1, %v3041_v20, %v954_v44  ;;  %v959_v54 = vrot.slane %v3092_v30, 2 }
 0x121   : > { %v615_v28 = vadd.f32 %v583_v40, %v445_v49  ;;  %v1408_v40 = vrot.slane %v1908_v51, 2 }
 0x123   : > { %v447_v26 = vpop.f32.mrf.mxu1  ;;  %v708_v33 = vpop.f32.mrf.mxu3 }
 0x124   : > { %v740_v2 = vadd.f32 %v708_v33, %v615_v28  ;;  %v448_v1 = vadd.f32 %v447_v26, %v3082_v48  ;;  %v1910_v48 = vld [vmem:[%s2363_s4 + $0xb8] sm:$0x3] }
 0x125   : > { %v886_v13 = vpop.f32.mrf.mxu0  ;;  %1167 = vmatmul.f32.gmra.mxu2 %v1906_v8  ;;  %v1257_v28 = vrot.slane %v1910_v48, 1 }
 0x126   : > { %v3237_v18 = vadd.f32 %v886_v13, %v740_v2  ;;  %1042 = vmatmul.f32.gmra.mxu1 %v950_v27 }
 0x128   : > { %1345 = vmatmul.f32.gmra.mxu3 %v1253_v35  ;;  %1496 = vmatmul.f32.gmra.mxu0 %v1405_v29  ;;  %v586_v42 = vpop.f32.mrf.mxu2 }
 0x129   : > { %v616_v11 = vadd.f32 %v586_v42, %v448_v1 }
 0x12b   : > { %v450_v8 = vpop.f32.mrf.mxu1  ;;  %v711_v0 = vpop.f32.mrf.mxu3 }
 0x12c   : > { %v741_v4 = vadd.f32 %v711_v0, %v616_v11  ;;  %v451_v49 = vadd.f32 %v450_v8, %v3103_v53  ;;  %v1410_v53 = vsel %vm468_vm1, %v1408_v40, %v1409_v24  ;;  %v961_v0 = vrot.slane %v3107_v21, 2 }
 0x12d   : > { %v889_v45 = vpop.f32.mrf.mxu0  ;;  %1170 = vmatmul.f32.gmra.mxu2 %v1908_v51  ;;  %v1411_v51 = vrot.slane %v1910_v48, 2 }
 0x12e   : > { %v3244_v10 = vadd.f32 %v889_v45, %v741_v4  ;;  %1045 = vmatmul.f32.gmra.mxu1 %v3063_v5  ;;  %v1258_v5 = vsel %vm264_vm0, %v1255_v17, %v1257_v28  ;;  %v1913_v17 = vld [vmem:[%s2363_s4 + $0xd0] sm:$0x3]  ;;  %v962_v4 = vrot.slane %v3114_v16, 2 }
 0x130   : > { %1348 = vmatmul.f32.gmra.mxu3 %v1256_v34  ;;  %1499 = vmatmul.f32.gmra.mxu0 %v1407_v59  ;;  %v589_v32 = vpop.f32.mrf.mxu2  ;;  %v1262_v34 = vrot.slane %v1913_v17, 1 }
 0x131   : > { %v617_v58 = vadd.f32 %v589_v32, %v451_v49  ;;  %v1915_v32 = vld [vmem:[%s2363_s4 + $0xe0] sm:$0xff] }
 0x132   : > { %v1263_v30 = vsel %vm264_vm0, %v3123_v37, %v1262_v34 }
 0x133   : > { %v453_v26 = vpop.f32.mrf.mxu1  ;;  %v714_v33 = vpop.f32.mrf.mxu3 }
 0x134   : > { %v742_v27 = vadd.f32 %v714_v33, %v617_v58  ;;  %v454_v13 = vadd.f32 %v453_v26, %v3132_v14 }
 0x135   : > { %v892_v2 = vpop.f32.mrf.mxu0  ;;  %1173 = vmatmul.f32.gmra.mxu2 %v1909_v23  ;;  %v1412_v23 = vsel %vm468_vm1, %v1409_v24, %v1411_v51  ;;  %v1265_v24 = vrot.slane %v1915_v32, 1 }
 0x136   : > { %v3254_v22 = vadd.f32 %v892_v2, %v742_v27  ;;  %1048 = vmatmul.f32.gmra.mxu1 %v955_v15 }
 0x138   : > { %1351 = vmatmul.f32.gmra.mxu3 %v1258_v5  ;;  %1502 = vmatmul.f32.gmra.mxu0 %v1410_v53  ;;  %v592_v35 = vpop.f32.mrf.mxu2 }
 0x139   : > { %v618_v29 = vadd.f32 %v592_v35, %v454_v13  ;;  %v964_v13 = vrot.slane %v3136_v6, 2  ;;  %v3410_v6 = vld [vmem:[#allocation8_spill] sm:$0xff] }
 0x13b   : > { %v456_v1 = vpop.f32.mrf.mxu1  ;;  %v717_v20 = vpop.f32.mrf.mxu3 }
 0x13c   : > { %v743_v42 = vadd.f32 %v717_v20, %v618_v29  ;;  %v457_v14 = vadd.f32 %v456_v1, %v3070_v7  ;;  %v1419_v20 = vrot.slane %v1915_v32, 2 }
 0x13d   : > { %v895_v11 = vpop.f32.mrf.mxu0  ;;  %1176 = vmatmul.f32.gmra.mxu2 %v3107_v21  ;;  %v1914_v21 = vld [vmem:[%s2363_s4 + $0xd8] sm:$0xff] }
 0x13e   : > { %v3259_v57 = vadd.f32 %v895_v11, %v743_v42  ;;  %1051 = vmatmul.f32.gmra.mxu1 %v3101_v19  ;;  %v960_v19 = vsel %vm468_vm1, %v3087_v43, %v959_v54  ;;  %v1264_v28 = vrot.slane %v1914_v21, 1  ;;  %v1418_v29 = vrot.slane %v1914_v21, 2 }
 0x140   : > { %1354 = vmatmul.f32.gmra.mxu3 %v3129_v61  ;;  %1505 = vmatmul.f32.gmra.mxu0 %v1412_v23  ;;  %v595_v8 = vpop.f32.mrf.mxu2  ;;  %v1415_v61 = vsel %vm468_vm1, %v961_v0, %v962_v4  ;;  %v1266_v27 = vsel %vm264_vm0, %v1264_v28, %v1265_v24  ;;  %v965_v23 = vsel %vm468_vm1, %v962_v4, %v964_v13 }
 0x141   : > { %v619_v45 = vadd.f32 %v595_v8, %v457_v14 }
 0x143   : > { %v459_v59 = vpop.f32.mrf.mxu1  ;;  %v720_v48 = vpop.f32.mrf.mxu3 }
 0x144   : > { %v744_v7 = vadd.f32 %v720_v48, %v619_v45  ;;  %v460_v40 = vadd.f32 %v459_v59, %v3089_v38  ;;  %v1916_v38 = vld [vmem:[%s2363_s4 + $0xe8] sm:$0x3]  ;;  %s3298_s4 = sand.u32 1, %s2205_s13  }
 0x145   : > { %v898_v49 = vpop.f32.mrf.mxu0  ;;  %1179 = vmatmul.f32.gmra.mxu2 %v3114_v16  ;;  %v1416_v16 = vrot.slane %v1913_v17, 2  ;;  %v1267_v1 = vrot.slane %v1916_v38, 1  ;;  %v1421_v59 = vrot.slane %v1916_v38, 2  ;;  %s1780_s11 = sshll.u32 %s3298_s4, 7  ;;  %s1615_s10 = scalar_lea.sflag [#allocation3], %s3298_s4 }
 0x146   : > { %v3274_v44 = vadd.f32 %v898_v49, %v744_v7  ;;  %1054 = vmatmul.f32.gmra.mxu1 %v960_v19  ;;  %v910_v7 = vadd.f32 %v3154_v46, %v3152_v25  ;;  %s3303_s20 = scalar_lea.vmem [#allocation2], %s1780_s11  ;;  %s2117_s11 = sshra.s32 %s1638_s8, 4  ;;  %s2118_s11 = int_to_ptr.hbm [resolvable:$true] %s2117_s11 }
 0x147   : > { %v1417_v2 = vsel %vm468_vm1, %v962_v4, %v1416_v16  ;;  %v1268_v54 = vsel %vm264_vm0, %v1265_v24, %v1267_v1  ;;  %v911_v24 = vadd.f32 %v3160_v31, %v3158_v52  ;;  %s1635_s7 = sshll.u32 %s3303_s20, 4  ;;  %s2119_s21 = scalar_lea.hbm %s2118_s11, 128  ;;  %s1636_s7 = int_to_ptr.vmem [resolvable:$true] %s1635_s7 }
 0x148   : > { %1357 = vmatmul.f32.gmra.mxu3 %v1263_v30  ;;  %1508 = vmatmul.f32.gmra.mxu0 %v1415_v61  ;;  %v598_v43 = vpop.f32.mrf.mxu2  ;;  %v1422_v30 = vsel %vm468_vm1, %v1419_v20, %v1421_v59  ;;  %p2120_p13 = scmp.ne.s32.totalorder %s2118_s11, %s2119_s21  ;;  %p2124_p2 = scmp.lt.s32.totalorder %s2118_s11, %s3405_s2 }
 0x149   : > { %v620_v58 = vadd.f32 %v598_v43, %v460_v40  ;;  %p2125_p4 = scmp.lt.s32.totalorder %s2123_s28, %s2119_s21 }
 0x14a   : > { %p2121_p0 = pnand %p2120_p13, %p2304_p3 }
 0x14b   : > { %v462_v26 = vpop.f32.mrf.mxu1  ;;  %v723_v33 = vpop.f32.mrf.mxu3  ;;  %p2126_p5 = por %p2125_p4, %p2124_p2 }
 0x14c   : > { %v745_v37 = vadd.f32 %v723_v33, %v620_v58  ;;  %v463_v53 = vadd.f32 %v462_v26, %v3117_v36  ;;  %v1420_v36 = vsel %vm468_vm1, %v1418_v29, %v1419_v20  ;;  %p2122_p1 = pneg %p2121_p0 }
 0x14d   : > { %v901_v15 = vpop.f32.mrf.mxu0  ;;  %1182 = vmatmul.f32.gmra.mxu2 %v1914_v21 }
 0x14e   : > { %v3281_v5 = vadd.f32 %v901_v15, %v745_v37  ;;  %1057 = vmatmul.f32.gmra.mxu1 %v1415_v61  ;;  %p2127_p6 = pnand %p2126_p5, %p2122_p1 }
 0x150   : > { %1360 = vmatmul.f32.gmra.mxu3 %v1266_v27  ;;  %1511 = vmatmul.f32.gmra.mxu0 %v1417_v2  ;;  %v601_v35 = vpop.f32.mrf.mxu2  ;;  %v912_v2 = vadd.f32 %v3172_v50, %v3170_v47 }
 0x151   : > { %v621_v51 = vadd.f32 %v601_v35, %v463_v53 }
 0x153   : > { %v465_v42 = vpop.f32.mrf.mxu1  ;;  %v726_v11 = vpop.f32.mrf.mxu3 }
 0x154   : > { %v746_v17 = vadd.f32 %v726_v11, %v621_v51  ;;  %v466_v0 = vadd.f32 %v465_v42, %v3410_v6 }
 0x155   : > { %v904_v14 = vpop.f32.mrf.mxu0  ;;  %1185 = vmatmul.f32.gmra.mxu2 %v1915_v32 }
 0x156   : > { %v3289_v8 = vadd.f32 %v904_v14, %v746_v17  ;;  %1060 = vmatmul.f32.gmra.mxu1 %v965_v23  ;;  %v913_v23 = vadd.f32 %v3182_v63, %v3180_v12 }
 0x158   : > { %1363 = vmatmul.f32.gmra.mxu3 %v1268_v54  ;;  %1514 = vmatmul.f32.gmra.mxu0 %v1420_v36  ;;  %v604_v45 = vpop.f32.mrf.mxu2 }
 0x159   : > { %v622_v34 = vadd.f32 %v604_v45, %v466_v0 }
 0x15b   : > { %v729_v48 = vpop.f32.mrf.mxu3  ;;  %v1016_v4 = vpop.f32.mrf.mxu1 }
 0x15c   : > { %v747_v19 = vadd.f32 %v729_v48, %v622_v34  ;;  %v1064_v21 = vadd.f32 %v1016_v4, %v910_v7  ;;  %v914_v48 = vadd.f32 %v3195_v62, %v3193_v9 }
 0x15d   : > { %v907_v49 = vpop.f32.mrf.mxu0 }
 0x15e   : > { %v3295_v61 = vadd.f32 %v907_v49, %v747_v19 }
 0x160   : > { %1517 = vmatmul.f32.gmra.mxu0 %v1422_v30  ;;  %v1141_v32 = vpop.f32.mrf.mxu2 }
 0x161   : > { %v1189_v40 = vadd.f32 %v1141_v32, %v1064_v21 }
 0x163   : > { %v1019_v43 = vpop.f32.mrf.mxu1  ;;  %v1319_v58 = vpop.f32.mrf.mxu3 }
 0x164   : > { %v1367_v28 = vadd.f32 %v1319_v58, %v1189_v40  ;;  %v1065_v16 = vadd.f32 %v1019_v43, %v911_v24  ;;  %v915_v58 = vadd.f32 %v3204_v56, %v3202_v3 }
 0x165   : > { %v1473_v25 = vpop.f32.mrf.mxu0 }
 0x166   : > { %v1521_v46 = vadd.f32 %v1473_v25, %v1367_v28 }
 0x168   : > { %1537 = vst [vmem:[%s3303_s20] sm:$0xff] %v1521_v46  ;;  %v1144_v26 = vpop.f32.mrf.mxu2  ;;  %v1574_v31 = vmul.f32 %v1521_v46, %v1521_v46 }
 0x169   : > { %v1190_v33 = vadd.f32 %v1144_v26, %v1065_v16 }
 0x16b   : > { %v1022_v37 = vpop.f32.mrf.mxu1  ;;  %v1322_v15 = vpop.f32.mrf.mxu3 }
 0x16c   : > { %v1368_v27 = vadd.f32 %v1322_v15, %v1190_v33  ;;  %v1066_v52 = vadd.f32 %v1022_v37, %v912_v2 }
 0x16d   : > { %v1476_v38 = vpop.f32.mrf.mxu0 }
 0x16e   : > { %v1522_v53 = vadd.f32 %v1476_v38, %v1368_v27  ;;  %v916_v27 = vadd.f32 %v3216_v60, %v3214_v55 }
 0x170   : > { %1538 = vst [vmem:[%s3303_s20 + $0x8] sm:$0xff] %v1522_v53  ;;  %v1553_v13 = vadd.f32 %v1522_v53, %v1521_v46  ;;  %v1575_v35 = vmul.f32 %v1522_v53, %v1522_v53  ;;  %v1147_v29 = vpop.f32.mrf.mxu2 }
 0x171   : > { %v1191_v51 = vadd.f32 %v1147_v29, %v1066_v52 }
 0x172   : > { %v1590_v1 = vadd.f32 %v1575_v35, %v1574_v31 }
 0x173   : > { %v1025_v20 = vpop.f32.mrf.mxu1  ;;  %v1325_v42 = vpop.f32.mrf.mxu3 }
 0x174   : > { %v1369_v11 = vadd.f32 %v1325_v42, %v1191_v51  ;;  %v1067_v50 = vadd.f32 %v1025_v20, %v913_v23 }
 0x175   : > { %v1479_v17 = vpop.f32.mrf.mxu0 }
 0x176   : > { %v1523_v47 = vadd.f32 %v1479_v17, %v1369_v11 }
 0x178   : > { %1539 = vst [vmem:[%s3303_s20 + $0x10] sm:$0xff] %v1523_v47  ;;  %v1554_v14 = vadd.f32 %v1553_v13, %v1523_v47  ;;  %v1576_v54 = vmul.f32 %v1523_v47, %v1523_v47  ;;  %v1150_v36 = vpop.f32.mrf.mxu2 }
 0x179   : > { %v1192_v6 = vadd.f32 %v1150_v36, %v1067_v50 }
 0x17a   : > { %v1591_v0 = vadd.f32 %v1590_v1, %v1576_v54  ;;  %v917_v1 = vadd.f32 %v3225_v41, %v3223_v39 }
 0x17b   : > { %v1028_v45 = vpop.f32.mrf.mxu1  ;;  %v1328_v34 = vpop.f32.mrf.mxu3 }
 0x17c   : > { %v1370_v59 = vadd.f32 %v1328_v34, %v1192_v6  ;;  %v1068_v12 = vadd.f32 %v1028_v45, %v914_v48 }
 0x17d   : > { %v1482_v4 = vpop.f32.mrf.mxu0 }
 0x17e   : > { %v1524_v19 = vadd.f32 %v1482_v4, %v1370_v59 }
 0x180   : > { %1540 = vst [vmem:[%s3303_s20 + $0x18] sm:$0xff] %v1524_v19  ;;  %v1555_v63 = vadd.f32 %v1554_v14, %v1524_v19  ;;  %v1577_v7 = vmul.f32 %v1524_v19, %v1524_v19  ;;  %v1153_v49 = vpop.f32.mrf.mxu2 }
 0x181   : > { %v1193_v30 = vadd.f32 %v1153_v49, %v1068_v12 }
 0x182   : > { %v1592_v21 = vadd.f32 %v1591_v0, %v1577_v7 }
 0x183   : > { %v1031_v32 = vpop.f32.mrf.mxu1  ;;  %v1331_v40 = vpop.f32.mrf.mxu3 }
 0x184   : > { %v1371_v43 = vadd.f32 %v1331_v40, %v1193_v30  ;;  %v1069_v9 = vadd.f32 %v1031_v32, %v915_v58 }
 0x185   : > { %v1485_v28 = vpop.f32.mrf.mxu0 }
 0x186   : > { %v1525_v24 = vadd.f32 %v1485_v28, %v1371_v43 }
 0x188   : > { %1541 = vst [vmem:[%s3303_s20 + $0x20] sm:$0xff] %v1525_v24  ;;  %v1556_v62 = vadd.f32 %v1555_v63, %v1525_v24  ;;  %v1578_v25 = vmul.f32 %v1525_v24, %v1525_v24  ;;  %v1156_v46 = vpop.f32.mrf.mxu2 }
 0x189   : > { %v1194_v16 = vadd.f32 %v1156_v46, %v1069_v9 }
 0x18a   : > { %v1593_v26 = vadd.f32 %v1592_v21, %v1578_v25 }
 0x18b   : > { %v1034_v33 = vpop.f32.mrf.mxu1  ;;  %v1334_v37 = vpop.f32.mrf.mxu3 }
 0x18c   : > { %v1372_v15 = vadd.f32 %v1334_v37, %v1194_v16  ;;  %v1070_v3 = vadd.f32 %v1034_v33, %v916_v27 }
 0x18d   : > { %v1488_v2 = vpop.f32.mrf.mxu0 }
 0x18e   : > { %v1526_v38 = vadd.f32 %v1488_v2, %v1372_v15 }
 0x190   : > { %1542 = vst [vmem:[%s3303_s20 + $0x28] sm:$0xff] %v1526_v38  ;;  %v1557_v56 = vadd.f32 %v1556_v62, %v1526_v38  ;;  %v1579_v53 = vmul.f32 %v1526_v38, %v1526_v38  ;;  %v1159_v52 = vpop.f32.mrf.mxu2 }
 0x191   : > { %v1195_v31 = vadd.f32 %v1159_v52, %v1070_v3 }
 0x192   : > { %v1594_v13 = vadd.f32 %v1593_v26, %v1579_v53 }
 0x193   : > { %v1037_v35 = vpop.f32.mrf.mxu1  ;;  %v1337_v29 = vpop.f32.mrf.mxu3 }
 0x194   : > { %v1373_v51 = vadd.f32 %v1337_v29, %v1195_v31  ;;  %v1071_v55 = vadd.f32 %v1037_v35, %v917_v1 }
 0x195   : > { %v1491_v20 = vpop.f32.mrf.mxu0 }
 0x196   : > { %v1527_v42 = vadd.f32 %v1491_v20, %v1373_v51 }
 0x198   : > { %1543 = vst [vmem:[%s3303_s20 + $0x30] sm:$0xff] %v1527_v42  ;;  %v1558_v60 = vadd.f32 %v1557_v56, %v1527_v42  ;;  %v1580_v11 = vmul.f32 %v1527_v42, %v1527_v42  ;;  %v1162_v23 = vpop.f32.mrf.mxu2 }
 0x199   : > { %v1196_v17 = vadd.f32 %v1162_v23, %v1071_v55 }
 0x19a   : > { %v1595_v47 = vadd.f32 %v1594_v13, %v1580_v11 }
 0x19b   : > { %v1040_v50 = vpop.f32.mrf.mxu1  ;;  %v1340_v14 = vpop.f32.mrf.mxu3 }
 0x19c   : > { %v1374_v54 = vadd.f32 %v1340_v14, %v1196_v17  ;;  %v1072_v0 = vadd.f32 %v1040_v50, %v3237_v18 }
 0x19d   : > { %v1494_v36 = vpop.f32.mrf.mxu0 }
 0x19e   : > { %v1528_v6 = vadd.f32 %v1494_v36, %v1374_v54 }
 0x1a0   : > { %1544 = vst [vmem:[%s3303_s20 + $0x38] sm:$0xff] %v1528_v6  ;;  %v1559_v39 = vadd.f32 %v1558_v60, %v1528_v6  ;;  %v1581_v41 = vmul.f32 %v1528_v6, %v1528_v6  ;;  %v1165_v45 = vpop.f32.mrf.mxu2 }
 0x1a1   : > { %v1197_v34 = vadd.f32 %v1165_v45, %v1072_v0 }
 0x1a2   : > { %v1596_v59 = vadd.f32 %v1595_v47, %v1581_v41 }
 0x1a3   : > { %v1043_v48 = vpop.f32.mrf.mxu1  ;;  %v1343_v4 = vpop.f32.mrf.mxu3 }
 0x1a4   : > { %v1375_v19 = vadd.f32 %v1343_v4, %v1197_v34  ;;  %v1073_v7 = vadd.f32 %v1043_v48, %v3244_v10 }
 0x1a5   : > { %v1497_v12 = vpop.f32.mrf.mxu0 }
 0x1a6   : > { %v1529_v63 = vadd.f32 %v1497_v12, %v1375_v19 }
 0x1a8   : > { %1545 = vst [vmem:[%s3303_s20 + $0x40] sm:$0xff] %v1529_v63  ;;  %v1560_v49 = vadd.f32 %v1559_v39, %v1529_v63  ;;  %v1582_v30 = vmul.f32 %v1529_v63, %v1529_v63  ;;  %v1168_v21 = vpop.f32.mrf.mxu2 }
 0x1a9   : > { %v1198_v32 = vadd.f32 %v1168_v21, %v1073_v7 }
 0x1aa   : > { %v1597_v18 = vadd.f32 %v1596_v59, %v1582_v30 }
 0x1ab   : > { %v1046_v40 = vpop.f32.mrf.mxu1  ;;  %v1346_v43 = vpop.f32.mrf.mxu3 }
 0x1ac   : > { %v1376_v58 = vadd.f32 %v1346_v43, %v1198_v32  ;;  %v1074_v9 = vadd.f32 %v1046_v40, %v3254_v22 }
 0x1ad   : > { %v1500_v28 = vpop.f32.mrf.mxu0 }
 0x1ae   : > { %v1530_v24 = vadd.f32 %v1500_v28, %v1376_v58 }
 0x1b0   : > { %1546 = vst [vmem:[%s3303_s20 + $0x48] sm:$0xff] %v1530_v24  ;;  %v1561_v62 = vadd.f32 %v1560_v49, %v1530_v24  ;;  %v1583_v25 = vmul.f32 %v1530_v24, %v1530_v24  ;;  %v1171_v46 = vpop.f32.mrf.mxu2 }
 0x1b1   : > { %v1199_v16 = vadd.f32 %v1171_v46, %v1074_v9 }
 0x1b2   : > { %v1598_v10 = vadd.f32 %v1597_v18, %v1583_v25 }
 0x1b3   : > { %v1049_v26 = vpop.f32.mrf.mxu1  ;;  %v1349_v33 = vpop.f32.mrf.mxu3 }
 0x1b4   : > { %v1377_v37 = vadd.f32 %v1349_v33, %v1199_v16  ;;  %v1075_v2 = vadd.f32 %v1049_v26, %v3259_v57 }
 0x1b5   : > { %v1503_v15 = vpop.f32.mrf.mxu0 }
 0x1b6   : > { %v1531_v27 = vadd.f32 %v1503_v15, %v1377_v37 }
 0x1b8   : > { %1547 = vst [vmem:[%s3303_s20 + $0x50] sm:$0xff] %v1531_v27  ;;  %v1562_v38 = vadd.f32 %v1561_v62, %v1531_v27  ;;  %v1584_v3 = vmul.f32 %v1531_v27, %v1531_v27  ;;  %v1174_v56 = vpop.f32.mrf.mxu2 }
 0x1b9   : > { %v1200_v53 = vadd.f32 %v1174_v56, %v1075_v2 }
 0x1ba   : > { %v1599_v22 = vadd.f32 %v1598_v10, %v1584_v3 }
 0x1bb   : > { %v1052_v52 = vpop.f32.mrf.mxu1  ;;  %v1352_v31 = vpop.f32.mrf.mxu3 }
 0x1bc   : > { %v1378_v13 = vadd.f32 %v1352_v31, %v1200_v53  ;;  %v1076_v51 = vadd.f32 %v1052_v52, %v3274_v44 }
 0x1bd   : > { %v1506_v35 = vpop.f32.mrf.mxu0 }
 0x1be   : > { %v1532_v29 = vadd.f32 %v1506_v35, %v1378_v13 }
 0x1c0   : > { %1548 = vst [vmem:[%s3303_s20 + $0x58] sm:$0xff] %v1532_v29  ;;  %v1563_v1 = vadd.f32 %v1562_v38, %v1532_v29  ;;  %v1585_v20 = vmul.f32 %v1532_v29, %v1532_v29  ;;  %v1177_v42 = vpop.f32.mrf.mxu2 }
 0x1c1   : > { %v1201_v55 = vadd.f32 %v1177_v42, %v1076_v51 }
 0x1c2   : > { %v1600_v57 = vadd.f32 %v1599_v22, %v1585_v20 }
 0x1c3   : > { %v1055_v60 = vpop.f32.mrf.mxu1  ;;  %v1355_v11 = vpop.f32.mrf.mxu3 }
 0x1c4   : > { %v1379_v23 = vadd.f32 %v1355_v11, %v1201_v55  ;;  %v1077_v50 = vadd.f32 %v1055_v60, %v3281_v5 }
 0x1c5   : > { %v1509_v17 = vpop.f32.mrf.mxu0 }
 0x1c6   : > { %v1533_v47 = vadd.f32 %v1509_v17, %v1379_v23 }
 0x1c8   : > { %1549 = vst [vmem:[%s3303_s20 + $0x60] sm:$0xff] %v1533_v47  ;;  %v1564_v14 = vadd.f32 %v1563_v1, %v1533_v47  ;;  %v1586_v54 = vmul.f32 %v1533_v47, %v1533_v47  ;;  %v1180_v44 = vpop.f32.mrf.mxu2 }
 0x1c9   : > { %v1202_v36 = vadd.f32 %v1180_v44, %v1077_v50 }
 0x1ca   : > { %v1601_v6 = vadd.f32 %v1600_v57, %v1586_v54 }
 0x1cb   : > { %v1058_v0 = vpop.f32.mrf.mxu1  ;;  %v1358_v39 = vpop.f32.mrf.mxu3 }
 0x1cc   : > { %v1380_v41 = vadd.f32 %v1358_v39, %v1202_v36  ;;  %v1078_v59 = vadd.f32 %v1058_v0, %v3289_v8 }
 0x1cd   : > { %v1512_v45 = vpop.f32.mrf.mxu0 }
 0x1ce   : > { %v1534_v34 = vadd.f32 %v1512_v45, %v1380_v41 }
 0x1d0   : > { %1550 = vst [vmem:[%s3303_s20 + $0x68] sm:$0xff] %v1534_v34  ;;  %v1565_v48 = vadd.f32 %v1564_v14, %v1534_v34  ;;  %v1587_v4 = vmul.f32 %v1534_v34, %v1534_v34  ;;  %v1183_v5 = vpop.f32.mrf.mxu2 }
 0x1d1   : > { %v1203_v19 = vadd.f32 %v1183_v5, %v1078_v59 }
 0x1d2   : > { %v1602_v12 = vadd.f32 %v1601_v6, %v1587_v4 }
 0x1d3   : > { %v1361_v63 = vpop.f32.mrf.mxu3  ;;  %v1061_v7 = vpop.f32.mrf.mxu1 }
 0x1d4   : > { %v1381_v49 = vadd.f32 %v1361_v63, %v1203_v19  ;;  %v1079_v32 = vadd.f32 %v1061_v7, %v3295_v61 }
 0x1d5   : > { %v1515_v30 = vpop.f32.mrf.mxu0 }
 0x1d6   : > { %v1535_v21 = vadd.f32 %v1515_v30, %v1381_v49 }
 0x1d8   : > { %1551 = vst [vmem:[%s3303_s20 + $0x70] sm:$0xff] %v1535_v21  ;;  %v1566_v8 = vadd.f32 %v1565_v48, %v1535_v21  ;;  %v1588_v18 = vmul.f32 %v1535_v21, %v1535_v21  ;;  %v1186_v40 = vpop.f32.mrf.mxu2 }
 0x1d9   : > { %v1204_v43 = vadd.f32 %v1186_v40, %v1079_v32 }
 0x1da   : > { %v1603_v58 = vadd.f32 %v1602_v12, %v1588_v18 }
 0x1db   : > { %v1364_v28 = vpop.f32.mrf.mxu3 }
 0x1dc   : > { %v1382_v24 = vadd.f32 %v1364_v28, %v1204_v43 }
 0x1dd   : > { %v1518_v9 = vpop.f32.mrf.mxu0 }
 0x1de   : > { %v1536_v61 = vadd.f32 %v1518_v9, %v1382_v24 }
 0x1e0   : > { %1552 = vst [vmem:[%s3303_s20 + $0x78] sm:$0xff] %v1536_v61  ;;  %v1567_v62 = vadd.f32 %v1566_v8, %v1536_v61  ;;  %v1589_v25 = vmul.f32 %v1536_v61, %v1536_v61 }
 0x1e1   : > { %2130 = shalt.err (!%p2127_p6)
}
 0x1e2   : > { %s2231_s16 = smov 128   ;;  %s2232_s20 = smov 8   ;;  %v1568_v46 = vrot.slane %v1567_v62, 4  ;;  %v1604_v16 = vadd.f32 %v1603_v58, %v1589_v25  ;;  %vm1611_vm2 = vcmask 1040384  }
 0x1e3   : > { %2025 = dma.vmem_to_hbm [thread:$0]  (%p2304_p3), %s1636_s7, 2048, %s1638_s8, %s1615_s10, %s2231_s16, %s2231_s16, %s2232_s20  }
 0x1e4   : > { %s1650_s6 = sadd.s32 %s2213_s15, %s1971_s9  ;;  %v1569_v10 = vadd.f32 %v1568_v46, %v1567_v62  ;;  %v1605_v26 = vrot.slane %v1604_v16, 4  ;;  %s1781_s24 = sshll.u32 %s3298_s4, 1 }
 0x1e5   : > { %s1972_s11 = sshll.u32 %s1650_s6, 1  ;;  %s190_s7 = scalar_lea.vmem [#allocation4], %s1781_s24 }
 0x1e6   : > { %v1570_v33 = vrot.slane %v1569_v10, 2  ;;  %v1606_v37 = vadd.f32 %v1605_v26, %v1604_v16  ;;  %s1652_s28 = scalar_lea.hbm %s3406_s3, %s1972_s11  ;;  %s1654_s8 = sshll.u32 %s190_s7, 4  ;;  %s1655_s8 = int_to_ptr.vmem [resolvable:$true] %s1654_s8 }
 0x1e7   : > { %s1656_s15 = sshll.u32 %s1652_s28, 4  ;;  %s1620_s9 = scalar_lea.sflag [#allocation5], %s3298_s4  ;;  %s1657_s15 = int_to_ptr.hbm [resolvable:$true] %s1656_s15 }
 0x1e8   : > { %v1571_v15 = vadd.f32 %v1570_v33, %v1569_v10  ;;  %v1607_v27 = vrot.slane %v1606_v37, 2  ;;  %s2145_s10 = sshra.s32 %s1657_s15, 4  ;;  %s2151_s20 = scalar_lea.hbm %s3406_s3, 8  ;;  %s2146_s10 = int_to_ptr.hbm [resolvable:$true] %s2145_s10 }
 0x1e9   : > { %s2147_s29 = scalar_lea.hbm %s2146_s10, 2  ;;  %p2152_p11 = scmp.lt.s32.totalorder %s2146_s10, %s3406_s3 }
 0x1ea   : > { %v1572_v2 = vrot.slane %v1571_v15, 1  ;;  %v1608_v38 = vadd.f32 %v1607_v27, %v1606_v37  ;;  %p2148_p7 = scmp.ne.s32.totalorder %s2146_s10, %s2147_s29  ;;  %p2153_p12 = scmp.lt.s32.totalorder %s2151_s20, %s2147_s29 }
 0x1ec   : > { %v1609_v3 = vrot.slane %v1608_v38, 1  ;;  %v1573_v56 = vadd.f32 %v1572_v2, %v1571_v15  ;;  %p2149_p9 = pnand %p2148_p7, %p2304_p3  ;;  %p2154_p13 = por %p2153_p12, %p2152_p11 }
 0x1ee   : > { %v1610_v53 = vadd.f32 %v1609_v3, %v1608_v38  ;;  %p2150_p10 = pneg %p2149_p9 }
 0x1f0   : > { %v1612_v22 = vsel %vm1611_vm2, %v1573_v56, %v1610_v53  ;;  %p2155_p0 = pnand %p2154_p13, %p2150_p10 }
 0x1f1   : > { %1613 = vst [vmem:[%s190_s7] sm:$0x3] %v1612_v22 }
 0x1f2   : > { %2158 = shalt.err (!%p2155_p0)
}
 0x1f3   : > { %2026 = dma.vmem_to_hbm [thread:$0]  (%p2304_p3), %s1655_s8, 32, %s1657_s15, %s1620_s9  }
 0x1f4 PF: > { %p2036_p1 = scmp.ge.s32.totalorder %s2229_s19, 2  ;;  %s1668_s4 = sand.u32 1, %s2201_s12  }
 0x1f5   : > { %s1669_s11 = scalar_lea.sflag [#allocation3], %s1668_s4 }
 0x1f6   : > { %p2030_p2 = pnand %p2036_p1, %p2313_p8 }
 0x1f8   : > { %p2031_p4 = pneg %p2030_p2 }
 0x1fa   : > { %2192 = dma.done.wait (%p2031_p4), %s1669_s11, 2048  }
 0x1fb   : > { %2194 = vsyncadd (%p2031_p4), %s1669_s11, 4294965248  ;;  %s1679_s21 = scalar_lea.sflag [#allocation5], %s1668_s4 }
 0x1fc   : > { %2196 = dma.done.wait (%p2031_p4), %s1679_s21, 32  }
 0x1fd   : > { %2198 = vsyncadd (%p2031_p4), %s1679_s21, 4294967264  ;;  %s20_s19 = sadd.s32 1, %s2229_s19   ;;  %s3411_s12 = smov %s2205_s13 }
 0x1fe   : > { %p17_p5 = scmp.ge.s32.totalorder %s20_s19, 6   ;;  %s3412_s13 = smov %s2209_s14 }
 0x1ff   : > { %s3413_s14 = smov %s2322_s30  ;;  %s3414_s15 = smov %s2221_s17 }
 0x200   : > { %s3415_s16 = smov %s2225_s18  ;;  %s3416_s17 = smov %s3419_s22 }
 0x201   : > { %s3417_s18 = smov %s3423_s23  ;;  %19 = sbr.rel (!%p17_p5) target bundleno = 7 (0x7), region = 91 }
 0x206   :  { %1685 = vsyncpa [#allocation3], 1 }
 0x207   :  { %1687 = vsyncpa [#allocation3 + $0x1], 1 }
 0x208   :  { %1688 = vsyncpa [#allocation5], 1 }
 0x209   :  { %1690 = vsyncpa [#allocation5 + $0x1], 1 }

</bundles_post_ra>
